<compile_context>
chip_gen: v6e
topology: v6e:2x2x1
jax: 0.10.0
libtpu: 0.0.40
codegen_flags: <defaults>
</compile_context>

<pallas_src>
import jax
import jax.numpy as jnp
from jax.experimental import pallas as pl
from jax.experimental.pallas import tpu as pltpu


def _round_up(x, m):
    return ((x + m - 1) // m) * m


def _pick_tile(n_pad, cap):
    """Largest multiple-of-128 divisor of n_pad that is <= cap (n_pad % 128 == 0)."""
    t = min(cap, n_pad)
    while n_pad % t != 0:
        t -= 128
    return t


# ----------------------------------------------------------------------------
# Kernel 1: one GIN layer (tiled over node rows i and aggregation axis k)
#   acc[i] = (1+eps) * x[i]            (k == 0)
#   acc[i] += A[i,k] @ x[k]            (every k, bf16 MXU, f32 accumulate)
#   epilogue (k == last):
#     h = relu(acc @ W1 + b1); h = relu(h @ W2 + b2)
#     out = h * bn_scale + bn_shift    (BN eval-mode folded into scale/shift)
# ----------------------------------------------------------------------------
def gin_layer_kernel(eps_ref, adj_ref, x_ref, xself_ref,
                     w1_ref, b1_ref, w2_ref, b2_ref,
                     scale_ref, shift_ref, out_ref, acc_ref):
    k = pl.program_id(1)

    @pl.when(k == 0)
    def _init():
        acc_ref[...] = (1.0 + eps_ref[0]) * xself_ref[...].astype(jnp.float32)

    acc_ref[...] += jnp.dot(adj_ref[...], x_ref[...],
                            preferred_element_type=jnp.float32)

    @pl.when(k == pl.num_programs(1) - 1)
    def _epilogue():
        h = jnp.dot(acc_ref[...], w1_ref[...],
                    preferred_element_type=jnp.float32) + b1_ref[...]
        h = jnp.maximum(h, 0.0)
        h = jnp.dot(h, w2_ref[...],
                    preferred_element_type=jnp.float32) + b2_ref[...]
        h = jnp.maximum(h, 0.0)
        out_ref[...] = (h * scale_ref[...] + shift_ref[...]).astype(out_ref.dtype)


def gin_layer(eps, adj, x, w1, b1, w2, b2, scale, shift, *, tm_cap=256, tk_cap=512):
    n_pad = adj.shape[0]
    f_pad = x.shape[1]
    h_pad = w1.shape[1]
    tm = _pick_tile(n_pad, tm_cap)
    tk = _pick_tile(n_pad, tk_cap)
    grid = (n_pad // tm, n_pad // tk)

    flops = (2 * n_pad * n_pad * f_pad
             + 2 * n_pad * f_pad * h_pad
             + 2 * n_pad * h_pad * h_pad)
    bytes_accessed = (adj.size * adj.dtype.itemsize
                      + 2 * x.size * x.dtype.itemsize
                      + n_pad * h_pad * 2
                      + (w1.size + w2.size + 4 * h_pad) * 4)

    return pl.pallas_call(
        gin_layer_kernel,
        out_shape=jax.ShapeDtypeStruct((n_pad, h_pad), jnp.bfloat16),
        grid=grid,
        in_specs=[
            pl.BlockSpec(memory_space=pltpu.MemorySpace.SMEM),   # eps (scalar)
            pl.BlockSpec((tm, tk), lambda i, k: (i, k)),         # adjacency stream
            pl.BlockSpec((tk, f_pad), lambda i, k: (k, 0)),      # x stream (k axis)
            pl.BlockSpec((tm, f_pad), lambda i, k: (i, 0)),      # x self-term (row)
            pl.BlockSpec((f_pad, h_pad), lambda i, k: (0, 0)),   # W1 (resident)
            pl.BlockSpec((1, h_pad), lambda i, k: (0, 0)),       # b1
            pl.BlockSpec((h_pad, h_pad), lambda i, k: (0, 0)),   # W2 (resident)
            pl.BlockSpec((1, h_pad), lambda i, k: (0, 0)),       # b2
            pl.BlockSpec((1, h_pad), lambda i, k: (0, 0)),       # BN scale
            pl.BlockSpec((1, h_pad), lambda i, k: (0, 0)),       # BN shift
        ],
        out_specs=pl.BlockSpec((tm, h_pad), lambda i, k: (i, 0)),
        scratch_shapes=[pltpu.VMEM((tm, f_pad), jnp.float32)],
        compiler_params=pltpu.CompilerParams(
            dimension_semantics=("parallel", "arbitrary"),
            vmem_limit_bytes=32 * 1024 * 1024),
        cost_estimate=pl.CostEstimate(flops=int(flops), transcendentals=0,
                                      bytes_accessed=int(bytes_accessed)),
    )(eps, adj, x, x, w1, b1, w2, b2, scale, shift)


# ----------------------------------------------------------------------------
# Kernel 2: readout head, tiled over the node axis
#   acc += P[:, k] @ h[k]              (global mean/add pool as blocked matmul)
#   epilogue: relu(acc @ W1 + b1) -> @ W2 + b2 -> log_softmax
#   (padded class columns carry a -1e30 bias so they vanish in the softmax)
# ----------------------------------------------------------------------------
def head_kernel(pool_ref, x_ref, w1_ref, b1_ref, w2_ref, b2_ref, out_ref, acc_ref):
    k = pl.program_id(0)

    @pl.when(k == 0)
    def _init():
        acc_ref[...] = jnp.zeros_like(acc_ref)

    acc_ref[...] += jnp.dot(pool_ref[...], x_ref[...].astype(jnp.float32),
                            preferred_element_type=jnp.float32)

    @pl.when(k == pl.num_programs(0) - 1)
    def _epilogue():
        h = jnp.dot(acc_ref[...], w1_ref[...],
                    preferred_element_type=jnp.float32) + b1_ref[...]
        h = jnp.maximum(h, 0.0)
        # TODO(synk): dropout(p=0.5) is identity in inference mode.
        logits = jnp.dot(h, w2_ref[...],
                         preferred_element_type=jnp.float32) + b2_ref[...]
        m = jnp.max(logits, axis=-1, keepdims=True)
        z = logits - m
        lse = jnp.log(jnp.sum(jnp.exp(z), axis=-1, keepdims=True))
        out_ref[...] = z - lse


def head(pool, x, w1, b1, w2, b2, *, tk_cap=512):
    g_pad, n_pad = pool.shape
    h_pad = w1.shape[1]
    c_pad = w2.shape[1]
    tk = _pick_tile(n_pad, tk_cap)
    grid = (n_pad // tk,)

    return pl.pallas_call(
        head_kernel,
        out_shape=jax.ShapeDtypeStruct((g_pad, c_pad), jnp.float32),
        grid=grid,
        in_specs=[
            pl.BlockSpec((g_pad, tk), lambda k: (0, k)),     # pooling matrix stream
            pl.BlockSpec((tk, h_pad), lambda k: (k, 0)),     # node features stream
            pl.BlockSpec((h_pad, h_pad), lambda k: (0, 0)),  # lin1 W (resident)
            pl.BlockSpec((1, h_pad), lambda k: (0, 0)),      # lin1 b
            pl.BlockSpec((h_pad, c_pad), lambda k: (0, 0)),  # lin2 W (resident)
            pl.BlockSpec((1, c_pad), lambda k: (0, 0)),      # lin2 b (padded w/ -1e30)
        ],
        out_specs=pl.BlockSpec((g_pad, c_pad), lambda k: (0, 0)),
        scratch_shapes=[pltpu.VMEM((g_pad, h_pad), jnp.float32)],
        compiler_params=pltpu.CompilerParams(
            dimension_semantics=("arbitrary",),
            vmem_limit_bytes=32 * 1024 * 1024),
    )(pool, x, w1, b1, w2, b2)


# ----------------------------------------------------------------------------
# Forward pass (hot path entirely in the two Pallas kernels above)
# ----------------------------------------------------------------------------
def gin0_forward(params, adj, x, pool):
    h = x.astype(jnp.bfloat16)
    for layer in params["convs"]:
        h = gin_layer(layer["eps"], adj, h,
                      layer["w1"], layer["b1"], layer["w2"], layer["b2"],
                      layer["scale"], layer["shift"])
    return head(pool, h,
                params["lin1_w"], params["lin1_b"],
                params["lin2_w"], params["lin2_b"])


# ----------------------------------------------------------------------------
# Parameter init (PyTorch Linear / BN semantics) + lane padding / BN folding
# ----------------------------------------------------------------------------
def init_params(key, num_features, hidden, num_classes, num_layers):
    def linear(k, fan_in, fan_out):
        kw, kb = jax.random.split(k)
        bound = 1.0 / jnp.sqrt(fan_in)
        w = jax.random.uniform(kw, (fan_in, fan_out), jnp.float32, -bound, bound)
        b = jax.random.uniform(kb, (fan_out,), jnp.float32, -bound, bound)
        return w, b

    keys = jax.random.split(key, num_layers + 2)
    convs = []
    in_dim = num_features
    for i in range(num_layers):
        k1, k2 = jax.random.split(keys[i])
        w1, b1 = linear(k1, in_dim, hidden)
        w2, b2 = linear(k2, hidden, hidden)
        convs.append(dict(
            eps=jnp.zeros((), jnp.float32),              # train_eps=True, init 0
            w1=w1, b1=b1, w2=w2, b2=b2,
            gamma=jnp.ones((hidden,), jnp.float32),
            beta=jnp.zeros((hidden,), jnp.float32),
            mean=jnp.zeros((hidden,), jnp.float32),
            var=jnp.ones((hidden,), jnp.float32),
        ))
        in_dim = hidden
    lin1_w, lin1_b = linear(keys[num_layers], hidden, hidden)
    lin2_w, lin2_b = linear(keys[num_layers + 1], hidden, num_classes)
    return dict(convs=convs, lin1_w=lin1_w, lin1_b=lin1_b,
                lin2_w=lin2_w, lin2_b=lin2_b)


def pad_params(params, num_features, hidden, num_classes):
    f_pad = _round_up(num_features, 128)
    h_pad = _round_up(hidden, 128)
    c_pad = _round_up(num_classes, 128)

    def pad2(w, r, c):
        return jnp.pad(w, ((0, r - w.shape[0]), (0, c - w.shape[1])))

    def pad_row(v, c, fill=0.0):
        return jnp.pad(v[None, :], ((0, 0), (0, c - v.shape[0])),
                       constant_values=fill)

    convs = []
    in_pad = f_pad
    for layer in params["convs"]:
        # Fold eval-mode BatchNorm into a single scale/shift per channel.
        scale = layer["gamma"] * jax.lax.rsqrt(layer["var"] + 1e-5)
        shift = layer["beta"] - layer["mean"] * scale
        convs.append(dict(
            eps=layer["eps"].reshape(1),
            w1=pad2(layer["w1"], in_pad, h_pad),
            b1=pad_row(layer["b1"], h_pad),
            w2=pad2(layer["w2"], h_pad, h_pad),
            b2=pad_row(layer["b2"], h_pad),
            scale=pad_row(scale, h_pad),
            shift=pad_row(shift, h_pad),
        ))
        in_pad = h_pad
    return dict(
        convs=convs,
        lin1_w=pad2(params["lin1_w"], h_pad, h_pad),
        lin1_b=pad_row(params["lin1_b"], h_pad),
        lin2_w=pad2(params["lin2_w"], h_pad, c_pad),
        # Fake (padded) classes get a huge negative bias -> exp() underflows to 0.
        lin2_b=pad_row(params["lin2_b"], c_pad, fill=-1e30),
    )


# ----------------------------------------------------------------------------
# Graph preprocessing (done once, outside the jitted forward)
# ----------------------------------------------------------------------------
def build_graph_inputs(x, edge_index, batch, num_graphs, add_pool=False):
    n, f = x.shape
    n_pad = _round_up(max(n, 128), 128)
    f_pad = _round_up(f, 128)
    g_pad = _round_up(max(num_graphs, 8), 8)

    src, dst = edge_index[0], edge_index[1]
    # A[dst, src] = edge multiplicity (PyG "source_to_target": aggregate x_j at target).
    adj = jnp.zeros((n, n), jnp.float32).at[dst, src].add(1.0)
    adj = jnp.pad(adj, ((0, n_pad - n), (0, n_pad - n))).astype(jnp.bfloat16)

    x_p = jnp.pad(x, ((0, n_pad - n), (0, f_pad - f)))

    one_hot = (batch[None, :] == jnp.arange(num_graphs)[:, None]).astype(jnp.float32)
    if add_pool:
        pool = one_hot
    else:
        counts = jnp.maximum(one_hot.sum(axis=1, keepdims=True), 1.0)
        pool = one_hot / counts
    pool = jnp.pad(pool, ((0, g_pad - num_graphs), (0, n_pad - n)))
    return adj, x_p, pool


if __name__ == "__main__":
    # Small synthetic graph batch: 2 graphs, 16 nodes total, 40 directed edges.
    NUM_FEATURES = 16
    HIDDEN = 32
    NUM_CLASSES = 4
    NUM_LAYERS = 3       # conv1 + 2 extra convs
    N_NODES = 16
    N_EDGES = 40
    NUM_GRAPHS = 2

    key = jax.random.PRNGKey(0)
    k_x, k_e, k_p = jax.random.split(key, 3)

    x = jax.random.normal(k_x, (N_NODES, NUM_FEATURES), jnp.float32)
    edge_index = jax.random.randint(k_e, (2, N_EDGES), 0, N_NODES, jnp.int32)
    batch = jnp.concatenate([jnp.zeros(8, jnp.int32), jnp.ones(8, jnp.int32)])

    params = init_params(k_p, NUM_FEATURES, HIDDEN, NUM_CLASSES, NUM_LAYERS)
    padded = pad_params(params, NUM_FEATURES, HIDDEN, NUM_CLASSES)
    adj, x_p, pool = build_graph_inputs(x, edge_index, batch, NUM_GRAPHS,
                                        add_pool=False)

    fwd = jax.jit(gin0_forward)
    out_padded = fwd(padded, adj, x_p, pool)
    out = jax.block_until_ready(out_padded)[:NUM_GRAPHS, :NUM_CLASSES]

    assert out.shape == (NUM_GRAPHS, NUM_CLASSES)
    assert bool(jnp.all(jnp.isfinite(out)))
    # log_softmax rows must exponentiate-sum to 1
    assert bool(jnp.allclose(jnp.exp(out).sum(-1), 1.0, atol=1e-4))
    print("KERNEL_OK")
</pallas_src>

<mosaic_0001>
module attributes {stable_mosaic.version = 11 : i64} {
  func.func @head_kernel(%arg0: i32, %arg1: memref<8x128xf32, #tpu.memory_space<vmem>>, %arg2: memref<128x128xbf16, #tpu.memory_space<vmem>>, %arg3: memref<128x128xf32, #tpu.memory_space<vmem>>, %arg4: memref<1x128xf32, #tpu.memory_space<vmem>>, %arg5: memref<128x128xf32, #tpu.memory_space<vmem>>, %arg6: memref<1x128xf32, #tpu.memory_space<vmem>>, %arg7: memref<8x128xf32, #tpu.memory_space<vmem>>, %arg8: memref<8x128xf32, #tpu.memory_space<vmem>>) attributes {dimension_semantics = [#tpu.dimension_semantics<arbitrary>], iteration_bounds = array<i64: 1>, scalar_prefetch = 0 : i64, scratch_operands = 1 : i64, tpu.core_type = #tpu.core_type<tc>, window_params = [{transform_indices = @transform_0, window_bounds = array<i64: 8, 128>}, {transform_indices = @transform_1, window_bounds = array<i64: 128, 128>}, {pipeline_mode = #tpu.pipeline_mode<synchronous>, transform_indices = @transform_2, window_bounds = array<i64: 128, 128>}, {pipeline_mode = #tpu.pipeline_mode<synchronous>, transform_indices = @transform_3, window_bounds = array<i64: 1, 128>}, {pipeline_mode = #tpu.pipeline_mode<synchronous>, transform_indices = @transform_4, window_bounds = array<i64: 128, 128>}, {pipeline_mode = #tpu.pipeline_mode<synchronous>, transform_indices = @transform_5, window_bounds = array<i64: 1, 128>}, {pipeline_mode = #tpu.pipeline_mode<synchronous>, transform_indices = @transform_6, window_bounds = array<i64: 8, 128>}]} {
    %c0_i32 = arith.constant 0 : i32
    %0 = arith.cmpi eq, %arg0, %c0_i32 : i32
    %1 = arith.extui %0 : i1 to i32
    %c0_i32_0 = arith.constant 0 : i32
    %2 = arith.cmpi ne, %1, %c0_i32_0 : i32
    scf.if %2 {
      %cst_10 = arith.constant 0.000000e+00 : f32
      %13 = vector.broadcast %cst_10 : f32 to vector<8x128xf32>
      %c0_11 = arith.constant 0 : index
      %c0_12 = arith.constant 0 : index
      %14 = vector.load %arg8[%c0_11, %c0_12] : memref<8x128xf32, #tpu.memory_space<vmem>>, vector<8x128xf32>
      tpu.vector_store %arg8[%c0_11, %c0_12], %13 {strides = array<i32>} : memref<8x128xf32, #tpu.memory_space<vmem>>, vector<8x128xf32>,
    } else {
    }
    %c0 = arith.constant 0 : index
    %c0_1 = arith.constant 0 : index
    %3 = vector.load %arg8[%c0, %c0_1] : memref<8x128xf32, #tpu.memory_space<vmem>>, vector<8x128xf32>
    %c0_2 = arith.constant 0 : index
    %c0_3 = arith.constant 0 : index
    %4 = vector.load %arg1[%c0_2, %c0_3] : memref<8x128xf32, #tpu.memory_space<vmem>>, vector<8x128xf32>
    %c0_4 = arith.constant 0 : index
    %c0_5 = arith.constant 0 : index
    %5 = vector.load %arg2[%c0_4, %c0_5] : memref<128x128xbf16, #tpu.memory_space<vmem>>, vector<128x128xbf16>
    %6 = arith.extf %5 : vector<128x128xbf16> to vector<128x128xf32>
    %cst = arith.constant dense<0.000000e+00> : vector<8x128xf32>
    %7 = tpu.matmul %4, %6, %cst {dimension_numbers = #tpu.dot_dimension_numbers<[1], [0], [0], [1], [0, 0, 1, 1], [], []>} : vector<8x128xf32>, vector<128x128xf32>, vector<8x128xf32> -> vector<8x128xf32>
    %8 = arith.addf %3, %7 : vector<8x128xf32>
    %c0_6 = arith.constant 0 : index
    %c0_7 = arith.constant 0 : index
    %9 = vector.load %arg8[%c0_6, %c0_7] : memref<8x128xf32, #tpu.memory_space<vmem>>, vector<8x128xf32>
    tpu.vector_store %arg8[%c0_6, %c0_7], %8 {strides = array<i32>} : memref<8x128xf32, #tpu.memory_space<vmem>>, vector<8x128xf32>,
    %c0_i32_8 = arith.constant 0 : i32
    %10 = arith.cmpi eq, %arg0, %c0_i32_8 : i32
    %11 = arith.extui %10 : i1 to i32
    %c0_i32_9 = arith.constant 0 : i32
    %12 = arith.cmpi ne, %11, %c0_i32_9 : i32
    scf.if %12 {
      %c0_10 = arith.constant 0 : index
      %c0_11 = arith.constant 0 : index
      %13 = vector.load %arg8[%c0_10, %c0_11] : memref<8x128xf32, #tpu.memory_space<vmem>>, vector<8x128xf32>
      %c0_12 = arith.constant 0 : index
      %c0_13 = arith.constant 0 : index
      %14 = vector.load %arg3[%c0_12, %c0_13] : memref<128x128xf32, #tpu.memory_space<vmem>>, vector<128x128xf32>
      %cst_14 = arith.constant dense<0.000000e+00> : vector<8x128xf32>
      %15 = tpu.matmul %13, %14, %cst_14 {dimension_numbers = #tpu.dot_dimension_numbers<[1], [0], [0], [1], [0, 0, 1, 1], [], []>} : vector<8x128xf32>, vector<128x128xf32>, vector<8x128xf32> -> vector<8x128xf32>
      %c0_15 = arith.constant 0 : index
      %c0_16 = arith.constant 0 : index
      %16 = vector.load %arg4[%c0_15, %c0_16] : memref<1x128xf32, #tpu.memory_space<vmem>>, vector<1x128xf32>
      %17 = vector.broadcast %16 : vector<1x128xf32> to vector<8x128xf32>
      %18 = arith.addf %15, %17 : vector<8x128xf32>
      %cst_17 = arith.constant 0.000000e+00 : f32
      %19 = vector.broadcast %cst_17 : f32 to vector<8x128xf32>
      %20 = arith.maximumf %18, %19 : vector<8x128xf32>
      %c0_18 = arith.constant 0 : index
      %c0_19 = arith.constant 0 : index
      %21 = vector.load %arg5[%c0_18, %c0_19] : memref<128x128xf32, #tpu.memory_space<vmem>>, vector<128x128xf32>
      %cst_20 = arith.constant dense<0.000000e+00> : vector<8x128xf32>
      %22 = tpu.matmul %20, %21, %cst_20 {dimension_numbers = #tpu.dot_dimension_numbers<[1], [0], [0], [1], [0, 0, 1, 1], [], []>} : vector<8x128xf32>, vector<128x128xf32>, vector<8x128xf32> -> vector<8x128xf32>
      %c0_21 = arith.constant 0 : index
      %c0_22 = arith.constant 0 : index
      %23 = vector.load %arg6[%c0_21, %c0_22] : memref<1x128xf32, #tpu.memory_space<vmem>>, vector<1x128xf32>
      %24 = vector.broadcast %23 : vector<1x128xf32> to vector<8x128xf32>
      %25 = arith.addf %22, %24 : vector<8x128xf32>
      %cst_23 = arith.constant dense<0xFF800000> : vector<8xf32>
      %26 = vector.multi_reduction <maximumf>, %25, %cst_23 [1] : vector<8x128xf32> to vector<8xf32>
      %27 = vector.shape_cast %26 : vector<8xf32> to vector<8x1xf32>
      %28 = vector.broadcast %27 : vector<8x1xf32> to vector<8x128xf32>
      %29 = arith.subf %25, %28 : vector<8x128xf32>
      %30 = math.exp %29 : vector<8x128xf32>
      %cst_24 = arith.constant dense<0.000000e+00> : vector<8xf32>
      %31 = vector.multi_reduction <add>, %30, %cst_24 [1] : vector<8x128xf32> to vector<8xf32>
      %32 = vector.shape_cast %31 : vector<8xf32> to vector<8x1xf32>
      %33 = math.log %32 : vector<8x1xf32>
      %34 = vector.broadcast %33 : vector<8x1xf32> to vector<8x128xf32>
      %35 = arith.subf %29, %34 : vector<8x128xf32>
      %c0_25 = arith.constant 0 : index
      %c0_26 = arith.constant 0 : index
      %36 = vector.load %arg7[%c0_25, %c0_26] : memref<8x128xf32, #tpu.memory_space<vmem>>, vector<8x128xf32>
      tpu.vector_store %arg7[%c0_25, %c0_26], %35 {strides = array<i32>} : memref<8x128xf32, #tpu.memory_space<vmem>>, vector<8x128xf32>,
    } else {
    }
    return
  }
  func.func @transform_0(%arg0: i32) -> (i32, i32) {
    %c0_i32 = arith.constant 0 : i32
    %c0_i32_0 = arith.constant 0 : i32
    return %c0_i32, %arg0 : i32, i32
  }
  func.func @transform_1(%arg0: i32) -> (i32, i32) {
    %c0_i32 = arith.constant 0 : i32
    %c0_i32_0 = arith.constant 0 : i32
    return %arg0, %c0_i32 : i32, i32
  }
  func.func @transform_2(%arg0: i32) -> (i32, i32) {
    %c0_i32 = arith.constant 0 : i32
    %c0_i32_0 = arith.constant 0 : i32
    %c0_i32_1 = arith.constant 0 : i32
    return %c0_i32, %c0_i32_0 : i32, i32
  }
  func.func @transform_3(%arg0: i32) -> (i32, i32) {
    %c0_i32 = arith.constant 0 : i32
    %c0_i32_0 = arith.constant 0 : i32
    %c0_i32_1 = arith.constant 0 : i32
    return %c0_i32, %c0_i32_0 : i32, i32
  }
  func.func @transform_4(%arg0: i32) -> (i32, i32) {
    %c0_i32 = arith.constant 0 : i32
    %c0_i32_0 = arith.constant 0 : i32
    %c0_i32_1 = arith.constant 0 : i32
    return %c0_i32, %c0_i32_0 : i32, i32
  }
  func.func @transform_5(%arg0: i32) -> (i32, i32) {
    %c0_i32 = arith.constant 0 : i32
    %c0_i32_0 = arith.constant 0 : i32
    %c0_i32_1 = arith.constant 0 : i32
    return %c0_i32, %c0_i32_0 : i32, i32
  }
  func.func @transform_6(%arg0: i32) -> (i32, i32) {
    %c0_i32 = arith.constant 0 : i32
    %c0_i32_0 = arith.constant 0 : i32
    %c0_i32_1 = arith.constant 0 : i32
    return %c0_i32, %c0_i32_0 : i32, i32
  }
}

module attributes {stable_mosaic.version = 11 : i64} {
  func.func @gin_layer_kernel(%arg0: i32, %arg1: i32, %arg2: memref<1xf32, #tpu.memory_space<smem>>, %arg3: memref<128x128xbf16, #tpu.memory_space<vmem>>, %arg4: memref<128x128xbf16, #tpu.memory_space<vmem>>, %arg5: memref<128x128xbf16, #tpu.memory_space<vmem>>, %arg6: memref<128x128xf32, #tpu.memory_space<vmem>>, %arg7: memref<1x128xf32, #tpu.memory_space<vmem>>, %arg8: memref<128x128xf32, #tpu.memory_space<vmem>>, %arg9: memref<1x128xf32, #tpu.memory_space<vmem>>, %arg10: memref<1x128xf32, #tpu.memory_space<vmem>>, %arg11: memref<1x128xf32, #tpu.memory_space<vmem>>, %arg12: memref<128x128xbf16, #tpu.memory_space<vmem>>, %arg13: memref<128x128xf32, #tpu.memory_space<vmem>>) attributes {dimension_semantics = [#tpu.dimension_semantics<parallel>, #tpu.dimension_semantics<arbitrary>], iteration_bounds = array<i64: 1, 1>, scalar_prefetch = 0 : i64, scratch_operands = 1 : i64, tpu.core_type = #tpu.core_type<tc>, window_params = [{transform_indices = @transform_0, window_bounds = array<i64: 1>}, {transform_indices = @transform_1, window_bounds = array<i64: 128, 128>}, {transform_indices = @transform_2, window_bounds = array<i64: 128, 128>}, {transform_indices = @transform_3, window_bounds = array<i64: 128, 128>}, {pipeline_mode = #tpu.pipeline_mode<synchronous>, transform_indices = @transform_4, window_bounds = array<i64: 128, 128>}, {pipeline_mode = #tpu.pipeline_mode<synchronous>, transform_indices = @transform_5, window_bounds = array<i64: 1, 128>}, {pipeline_mode = #tpu.pipeline_mode<synchronous>, transform_indices = @transform_6, window_bounds = array<i64: 128, 128>}, {pipeline_mode = #tpu.pipeline_mode<synchronous>, transform_indices = @transform_7, window_bounds = array<i64: 1, 128>}, {pipeline_mode = #tpu.pipeline_mode<synchronous>, transform_indices = @transform_8, window_bounds = array<i64: 1, 128>}, {pipeline_mode = #tpu.pipeline_mode<synchronous>, transform_indices = @transform_9, window_bounds = array<i64: 1, 128>}, {transform_indices = @transform_10, window_bounds = array<i64: 128, 128>}]} {
    %c0_i32 = arith.constant 0 : i32
    %0 = arith.cmpi eq, %arg1, %c0_i32 : i32
    %1 = arith.extui %0 : i1 to i32
    %c0_i32_0 = arith.constant 0 : i32
    %2 = arith.cmpi ne, %1, %c0_i32_0 : i32
    scf.if %2 {
      %c0_10 = arith.constant 0 : index
      %12 = memref.load %arg2[%c0_10] : memref<1xf32, #tpu.memory_space<smem>>
      %cst_11 = arith.constant 1.000000e+00 : f32
      %13 = arith.addf %cst_11, %12 : f32
      %c0_12 = arith.constant 0 : index
      %c0_13 = arith.constant 0 : index
      %14 = vector.load %arg5[%c0_12, %c0_13] : memref<128x128xbf16, #tpu.memory_space<vmem>>, vector<128x128xbf16>
      %15 = arith.extf %14 : vector<128x128xbf16> to vector<128x128xf32>
      %16 = vector.broadcast %13 : f32 to vector<128x128xf32>
      %17 = arith.mulf %16, %15 : vector<128x128xf32>
      %c0_14 = arith.constant 0 : index
      %c0_15 = arith.constant 0 : index
      %18 = vector.load %arg13[%c0_14, %c0_15] : memref<128x128xf32, #tpu.memory_space<vmem>>, vector<128x128xf32>
      tpu.vector_store %arg13[%c0_14, %c0_15], %17 {strides = array<i32>} : memref<128x128xf32, #tpu.memory_space<vmem>>, vector<128x128xf32>,
    } else {
    }
    %c0 = arith.constant 0 : index
    %c0_1 = arith.constant 0 : index
    %3 = vector.load %arg13[%c0, %c0_1] : memref<128x128xf32, #tpu.memory_space<vmem>>, vector<128x128xf32>
    %c0_2 = arith.constant 0 : index
    %c0_3 = arith.constant 0 : index
    %4 = vector.load %arg3[%c0_2, %c0_3] : memref<128x128xbf16, #tpu.memory_space<vmem>>, vector<128x128xbf16>
    %c0_4 = arith.constant 0 : index
    %c0_5 = arith.constant 0 : index
    %5 = vector.load %arg4[%c0_4, %c0_5] : memref<128x128xbf16, #tpu.memory_space<vmem>>, vector<128x128xbf16>
    %cst = arith.constant dense<0.000000e+00> : vector<128x128xf32>
    %6 = tpu.matmul %4, %5, %cst {dimension_numbers = #tpu.dot_dimension_numbers<[1], [0], [0], [1], [0, 0, 1, 1], [], []>} : vector<128x128xbf16>, vector<128x128xbf16>, vector<128x128xf32> -> vector<128x128xf32>
    %7 = arith.addf %3, %6 : vector<128x128xf32>
    %c0_6 = arith.constant 0 : index
    %c0_7 = arith.constant 0 : index
    %8 = vector.load %arg13[%c0_6, %c0_7] : memref<128x128xf32, #tpu.memory_space<vmem>>, vector<128x128xf32>
    tpu.vector_store %arg13[%c0_6, %c0_7], %7 {strides = array<i32>} : memref<128x128xf32, #tpu.memory_space<vmem>>, vector<128x128xf32>,
    %c0_i32_8 = arith.constant 0 : i32
    %9 = arith.cmpi eq, %arg1, %c0_i32_8 : i32
    %10 = arith.extui %9 : i1 to i32
    %c0_i32_9 = arith.constant 0 : i32
    %11 = arith.cmpi ne, %10, %c0_i32_9 : i32
    scf.if %11 {
      %c0_10 = arith.constant 0 : index
      %c0_11 = arith.constant 0 : index
      %12 = vector.load %arg13[%c0_10, %c0_11] : memref<128x128xf32, #tpu.memory_space<vmem>>, vector<128x128xf32>
      %c0_12 = arith.constant 0 : index
      %c0_13 = arith.constant 0 : index
      %13 = vector.load %arg6[%c0_12, %c0_13] : memref<128x128xf32, #tpu.memory_space<vmem>>, vector<128x128xf32>
      %cst_14 = arith.constant dense<0.000000e+00> : vector<128x128xf32>
      %14 = tpu.matmul %12, %13, %cst_14 {dimension_numbers = #tpu.dot_dimension_numbers<[1], [0], [0], [1], [0, 0, 1, 1], [], []>} : vector<128x128xf32>, vector<128x128xf32>, vector<128x128xf32> -> vector<128x128xf32>
      %c0_15 = arith.constant 0 : index
      %c0_16 = arith.constant 0 : index
      %15 = vector.load %arg7[%c0_15, %c0_16] : memref<1x128xf32, #tpu.memory_space<vmem>>, vector<1x128xf32>
      %16 = vector.broadcast %15 : vector<1x128xf32> to vector<128x128xf32>
      %17 = arith.addf %14, %16 : vector<128x128xf32>
      %cst_17 = arith.constant 0.000000e+00 : f32
      %18 = vector.broadcast %cst_17 : f32 to vector<128x128xf32>
      %19 = arith.maximumf %17, %18 : vector<128x128xf32>
      %c0_18 = arith.constant 0 : index
      %c0_19 = arith.constant 0 : index
      %20 = vector.load %arg8[%c0_18, %c0_19] : memref<128x128xf32, #tpu.memory_space<vmem>>, vector<128x128xf32>
      %cst_20 = arith.constant dense<0.000000e+00> : vector<128x128xf32>
      %21 = tpu.matmul %19, %20, %cst_20 {dimension_numbers = #tpu.dot_dimension_numbers<[1], [0], [0], [1], [0, 0, 1, 1], [], []>} : vector<128x128xf32>, vector<128x128xf32>, vector<128x128xf32> -> vector<128x128xf32>
      %c0_21 = arith.constant 0 : index
      %c0_22 = arith.constant 0 : index
      %22 = vector.load %arg9[%c0_21, %c0_22] : memref<1x128xf32, #tpu.memory_space<vmem>>, vector<1x128xf32>
      %23 = vector.broadcast %22 : vector<1x128xf32> to vector<128x128xf32>
      %24 = arith.addf %21, %23 : vector<128x128xf32>
      %cst_23 = arith.constant 0.000000e+00 : f32
      %25 = vector.broadcast %cst_23 : f32 to vector<128x128xf32>
      %26 = arith.maximumf %24, %25 : vector<128x128xf32>
      %c0_24 = arith.constant 0 : index
      %c0_25 = arith.constant 0 : index
      %27 = vector.load %arg10[%c0_24, %c0_25] : memref<1x128xf32, #tpu.memory_space<vmem>>, vector<1x128xf32>
      %28 = vector.broadcast %27 : vector<1x128xf32> to vector<128x128xf32>
      %29 = arith.mulf %26, %28 : vector<128x128xf32>
      %c0_26 = arith.constant 0 : index
      %c0_27 = arith.constant 0 : index
      %30 = vector.load %arg11[%c0_26, %c0_27] : memref<1x128xf32, #tpu.memory_space<vmem>>, vector<1x128xf32>
      %31 = vector.broadcast %30 : vector<1x128xf32> to vector<128x128xf32>
      %32 = arith.addf %29, %31 : vector<128x128xf32>
      %33 = arith.truncf %32 : vector<128x128xf32> to vector<128x128xbf16>
      %c0_28 = arith.constant 0 : index
      %c0_29 = arith.constant 0 : index
      %34 = vector.load %arg12[%c0_28, %c0_29] : memref<128x128xbf16, #tpu.memory_space<vmem>>, vector<128x128xbf16>
      tpu.vector_store %arg12[%c0_28, %c0_29], %33 {strides = array<i32>} : memref<128x128xbf16, #tpu.memory_space<vmem>>, vector<128x128xbf16>,
    } else {
    }
    return
  }
  func.func @transform_0(%arg0: i32, %arg1: i32) -> i32 {
    %c0_i32 = arith.constant 0 : i32
    %c0_i32_0 = arith.constant 0 : i32
    return %c0_i32 : i32
  }
  func.func @transform_1(%arg0: i32, %arg1: i32) -> (i32, i32) {
    %c0_i32 = arith.constant 0 : i32
    return %arg0, %arg1 : i32, i32
  }
  func.func @transform_2(%arg0: i32, %arg1: i32) -> (i32, i32) {
    %c0_i32 = arith.constant 0 : i32
    %c0_i32_0 = arith.constant 0 : i32
    return %arg1, %c0_i32 : i32, i32
  }
  func.func @transform_3(%arg0: i32, %arg1: i32) -> (i32, i32) {
    %c0_i32 = arith.constant 0 : i32
    %c0_i32_0 = arith.constant 0 : i32
    return %arg0, %c0_i32 : i32, i32
  }
  func.func @transform_4(%arg0: i32, %arg1: i32) -> (i32, i32) {
    %c0_i32 = arith.constant 0 : i32
    %c0_i32_0 = arith.constant 0 : i32
    %c0_i32_1 = arith.constant 0 : i32
    return %c0_i32, %c0_i32_0 : i32, i32
  }
  func.func @transform_5(%arg0: i32, %arg1: i32) -> (i32, i32) {
    %c0_i32 = arith.constant 0 : i32
    %c0_i32_0 = arith.constant 0 : i32
    %c0_i32_1 = arith.constant 0 : i32
    return %c0_i32, %c0_i32_0 : i32, i32
  }
  func.func @transform_6(%arg0: i32, %arg1: i32) -> (i32, i32) {
    %c0_i32 = arith.constant 0 : i32
    %c0_i32_0 = arith.constant 0 : i32
    %c0_i32_1 = arith.constant 0 : i32
    return %c0_i32, %c0_i32_0 : i32, i32
  }
  func.func @transform_7(%arg0: i32, %arg1: i32) -> (i32, i32) {
    %c0_i32 = arith.constant 0 : i32
    %c0_i32_0 = arith.constant 0 : i32
    %c0_i32_1 = arith.constant 0 : i32
    return %c0_i32, %c0_i32_0 : i32, i32
  }
  func.func @transform_8(%arg0: i32, %arg1: i32) -> (i32, i32) {
    %c0_i32 = arith.constant 0 : i32
    %c0_i32_0 = arith.constant 0 : i32
    %c0_i32_1 = arith.constant 0 : i32
    return %c0_i32, %c0_i32_0 : i32, i32
  }
  func.func @transform_9(%arg0: i32, %arg1: i32) -> (i32, i32) {
    %c0_i32 = arith.constant 0 : i32
    %c0_i32_0 = arith.constant 0 : i32
    %c0_i32_1 = arith.constant 0 : i32
    return %c0_i32, %c0_i32_0 : i32, i32
  }
  func.func @transform_10(%arg0: i32, %arg1: i32) -> (i32, i32) {
    %c0_i32 = arith.constant 0 : i32
    %c0_i32_0 = arith.constant 0 : i32
    return %arg0, %c0_i32 : i32, i32
  }
}

module attributes {stable_mosaic.version = 11 : i64} {
  func.func @gin_layer_kernel(%arg0: i32, %arg1: i32, %arg2: memref<1xf32, #tpu.memory_space<smem>>, %arg3: memref<128x128xbf16, #tpu.memory_space<vmem>>, %arg4: memref<128x128xbf16, #tpu.memory_space<vmem>>, %arg5: memref<128x128xbf16, #tpu.memory_space<vmem>>, %arg6: memref<128x128xf32, #tpu.memory_space<vmem>>, %arg7: memref<1x128xf32, #tpu.memory_space<vmem>>, %arg8: memref<128x128xf32, #tpu.memory_space<vmem>>, %arg9: memref<1x128xf32, #tpu.memory_space<vmem>>, %arg10: memref<1x128xf32, #tpu.memory_space<vmem>>, %arg11: memref<1x128xf32, #tpu.memory_space<vmem>>, %arg12: memref<128x128xbf16, #tpu.memory_space<vmem>>, %arg13: memref<128x128xf32, #tpu.memory_space<vmem>>) attributes {dimension_semantics = [#tpu.dimension_semantics<parallel>, #tpu.dimension_semantics<arbitrary>], iteration_bounds = array<i64: 1, 1>, scalar_prefetch = 0 : i64, scratch_operands = 1 : i64, tpu.core_type = #tpu.core_type<tc>, window_params = [{transform_indices = @transform_0, window_bounds = array<i64: 1>}, {transform_indices = @transform_1, window_bounds = array<i64: 128, 128>}, {transform_indices = @transform_2, window_bounds = array<i64: 128, 128>}, {transform_indices = @transform_3, window_bounds = array<i64: 128, 128>}, {pipeline_mode = #tpu.pipeline_mode<synchronous>, transform_indices = @transform_4, window_bounds = array<i64: 128, 128>}, {pipeline_mode = #tpu.pipeline_mode<synchronous>, transform_indices = @transform_5, window_bounds = array<i64: 1, 128>}, {pipeline_mode = #tpu.pipeline_mode<synchronous>, transform_indices = @transform_6, window_bounds = array<i64: 128, 128>}, {pipeline_mode = #tpu.pipeline_mode<synchronous>, transform_indices = @transform_7, window_bounds = array<i64: 1, 128>}, {pipeline_mode = #tpu.pipeline_mode<synchronous>, transform_indices = @transform_8, window_bounds = array<i64: 1, 128>}, {pipeline_mode = #tpu.pipeline_mode<synchronous>, transform_indices = @transform_9, window_bounds = array<i64: 1, 128>}, {transform_indices = @transform_10, window_bounds = array<i64: 128, 128>}]} {
    %c0_i32 = arith.constant 0 : i32
    %0 = arith.cmpi eq, %arg1, %c0_i32 : i32
    %1 = arith.extui %0 : i1 to i32
    %c0_i32_0 = arith.constant 0 : i32
    %2 = arith.cmpi ne, %1, %c0_i32_0 : i32
    scf.if %2 {
      %c0_10 = arith.constant 0 : index
      %12 = memref.load %arg2[%c0_10] : memref<1xf32, #tpu.memory_space<smem>>
      %cst_11 = arith.constant 1.000000e+00 : f32
      %13 = arith.addf %cst_11, %12 : f32
      %c0_12 = arith.constant 0 : index
      %c0_13 = arith.constant 0 : index
      %14 = vector.load %arg5[%c0_12, %c0_13] : memref<128x128xbf16, #tpu.memory_space<vmem>>, vector<128x128xbf16>
      %15 = arith.extf %14 : vector<128x128xbf16> to vector<128x128xf32>
      %16 = vector.broadcast %13 : f32 to vector<128x128xf32>
      %17 = arith.mulf %16, %15 : vector<128x128xf32>
      %c0_14 = arith.constant 0 : index
      %c0_15 = arith.constant 0 : index
      %18 = vector.load %arg13[%c0_14, %c0_15] : memref<128x128xf32, #tpu.memory_space<vmem>>, vector<128x128xf32>
      tpu.vector_store %arg13[%c0_14, %c0_15], %17 {strides = array<i32>} : memref<128x128xf32, #tpu.memory_space<vmem>>, vector<128x128xf32>,
    } else {
    }
    %c0 = arith.constant 0 : index
    %c0_1 = arith.constant 0 : index
    %3 = vector.load %arg13[%c0, %c0_1] : memref<128x128xf32, #tpu.memory_space<vmem>>, vector<128x128xf32>
    %c0_2 = arith.constant 0 : index
    %c0_3 = arith.constant 0 : index
    %4 = vector.load %arg3[%c0_2, %c0_3] : memref<128x128xbf16, #tpu.memory_space<vmem>>, vector<128x128xbf16>
    %c0_4 = arith.constant 0 : index
    %c0_5 = arith.constant 0 : index
    %5 = vector.load %arg4[%c0_4, %c0_5] : memref<128x128xbf16, #tpu.memory_space<vmem>>, vector<128x128xbf16>
    %cst = arith.constant dense<0.000000e+00> : vector<128x128xf32>
    %6 = tpu.matmul %4, %5, %cst {dimension_numbers = #tpu.dot_dimension_numbers<[1], [0], [0], [1], [0, 0, 1, 1], [], []>} : vector<128x128xbf16>, vector<128x128xbf16>, vector<128x128xf32> -> vector<128x128xf32>
    %7 = arith.addf %3, %6 : vector<128x128xf32>
    %c0_6 = arith.constant 0 : index
    %c0_7 = arith.constant 0 : index
    %8 = vector.load %arg13[%c0_6, %c0_7] : memref<128x128xf32, #tpu.memory_space<vmem>>, vector<128x128xf32>
    tpu.vector_store %arg13[%c0_6, %c0_7], %7 {strides = array<i32>} : memref<128x128xf32, #tpu.memory_space<vmem>>, vector<128x128xf32>,
    %c0_i32_8 = arith.constant 0 : i32
    %9 = arith.cmpi eq, %arg1, %c0_i32_8 : i32
    %10 = arith.extui %9 : i1 to i32
    %c0_i32_9 = arith.constant 0 : i32
    %11 = arith.cmpi ne, %10, %c0_i32_9 : i32
    scf.if %11 {
      %c0_10 = arith.constant 0 : index
      %c0_11 = arith.constant 0 : index
      %12 = vector.load %arg13[%c0_10, %c0_11] : memref<128x128xf32, #tpu.memory_space<vmem>>, vector<128x128xf32>
      %c0_12 = arith.constant 0 : index
      %c0_13 = arith.constant 0 : index
      %13 = vector.load %arg6[%c0_12, %c0_13] : memref<128x128xf32, #tpu.memory_space<vmem>>, vector<128x128xf32>
      %cst_14 = arith.constant dense<0.000000e+00> : vector<128x128xf32>
      %14 = tpu.matmul %12, %13, %cst_14 {dimension_numbers = #tpu.dot_dimension_numbers<[1], [0], [0], [1], [0, 0, 1, 1], [], []>} : vector<128x128xf32>, vector<128x128xf32>, vector<128x128xf32> -> vector<128x128xf32>
      %c0_15 = arith.constant 0 : index
      %c0_16 = arith.constant 0 : index
      %15 = vector.load %arg7[%c0_15, %c0_16] : memref<1x128xf32, #tpu.memory_space<vmem>>, vector<1x128xf32>
      %16 = vector.broadcast %15 : vector<1x128xf32> to vector<128x128xf32>
      %17 = arith.addf %14, %16 : vector<128x128xf32>
      %cst_17 = arith.constant 0.000000e+00 : f32
      %18 = vector.broadcast %cst_17 : f32 to vector<128x128xf32>
      %19 = arith.maximumf %17, %18 : vector<128x128xf32>
      %c0_18 = arith.constant 0 : index
      %c0_19 = arith.constant 0 : index
      %20 = vector.load %arg8[%c0_18, %c0_19] : memref<128x128xf32, #tpu.memory_space<vmem>>, vector<128x128xf32>
      %cst_20 = arith.constant dense<0.000000e+00> : vector<128x128xf32>
      %21 = tpu.matmul %19, %20, %cst_20 {dimension_numbers = #tpu.dot_dimension_numbers<[1], [0], [0], [1], [0, 0, 1, 1], [], []>} : vector<128x128xf32>, vector<128x128xf32>, vector<128x128xf32> -> vector<128x128xf32>
      %c0_21 = arith.constant 0 : index
      %c0_22 = arith.constant 0 : index
      %22 = vector.load %arg9[%c0_21, %c0_22] : memref<1x128xf32, #tpu.memory_space<vmem>>, vector<1x128xf32>
      %23 = vector.broadcast %22 : vector<1x128xf32> to vector<128x128xf32>
      %24 = arith.addf %21, %23 : vector<128x128xf32>
      %cst_23 = arith.constant 0.000000e+00 : f32
      %25 = vector.broadcast %cst_23 : f32 to vector<128x128xf32>
      %26 = arith.maximumf %24, %25 : vector<128x128xf32>
      %c0_24 = arith.constant 0 : index
      %c0_25 = arith.constant 0 : index
      %27 = vector.load %arg10[%c0_24, %c0_25] : memref<1x128xf32, #tpu.memory_space<vmem>>, vector<1x128xf32>
      %28 = vector.broadcast %27 : vector<1x128xf32> to vector<128x128xf32>
      %29 = arith.mulf %26, %28 : vector<128x128xf32>
      %c0_26 = arith.constant 0 : index
      %c0_27 = arith.constant 0 : index
      %30 = vector.load %arg11[%c0_26, %c0_27] : memref<1x128xf32, #tpu.memory_space<vmem>>, vector<1x128xf32>
      %31 = vector.broadcast %30 : vector<1x128xf32> to vector<128x128xf32>
      %32 = arith.addf %29, %31 : vector<128x128xf32>
      %33 = arith.truncf %32 : vector<128x128xf32> to vector<128x128xbf16>
      %c0_28 = arith.constant 0 : index
      %c0_29 = arith.constant 0 : index
      %34 = vector.load %arg12[%c0_28, %c0_29] : memref<128x128xbf16, #tpu.memory_space<vmem>>, vector<128x128xbf16>
      tpu.vector_store %arg12[%c0_28, %c0_29], %33 {strides = array<i32>} : memref<128x128xbf16, #tpu.memory_space<vmem>>, vector<128x128xbf16>,
    } else {
    }
    return
  }
  func.func @transform_0(%arg0: i32, %arg1: i32) -> i32 {
    %c0_i32 = arith.constant 0 : i32
    %c0_i32_0 = arith.constant 0 : i32
    return %c0_i32 : i32
  }
  func.func @transform_1(%arg0: i32, %arg1: i32) -> (i32, i32) {
    %c0_i32 = arith.constant 0 : i32
    return %arg0, %arg1 : i32, i32
  }
  func.func @transform_2(%arg0: i32, %arg1: i32) -> (i32, i32) {
    %c0_i32 = arith.constant 0 : i32
    %c0_i32_0 = arith.constant 0 : i32
    return %arg1, %c0_i32 : i32, i32
  }
  func.func @transform_3(%arg0: i32, %arg1: i32) -> (i32, i32) {
    %c0_i32 = arith.constant 0 : i32
    %c0_i32_0 = arith.constant 0 : i32
    return %arg0, %c0_i32 : i32, i32
  }
  func.func @transform_4(%arg0: i32, %arg1: i32) -> (i32, i32) {
    %c0_i32 = arith.constant 0 : i32
    %c0_i32_0 = arith.constant 0 : i32
    %c0_i32_1 = arith.constant 0 : i32
    return %c0_i32, %c0_i32_0 : i32, i32
  }
  func.func @transform_5(%arg0: i32, %arg1: i32) -> (i32, i32) {
    %c0_i32 = arith.constant 0 : i32
    %c0_i32_0 = arith.constant 0 : i32
    %c0_i32_1 = arith.constant 0 : i32
    return %c0_i32, %c0_i32_0 : i32, i32
  }
  func.func @transform_6(%arg0: i32, %arg1: i32) -> (i32, i32) {
    %c0_i32 = arith.constant 0 : i32
    %c0_i32_0 = arith.constant 0 : i32
    %c0_i32_1 = arith.constant 0 : i32
    return %c0_i32, %c0_i32_0 : i32, i32
  }
  func.func @transform_7(%arg0: i32, %arg1: i32) -> (i32, i32) {
    %c0_i32 = arith.constant 0 : i32
    %c0_i32_0 = arith.constant 0 : i32
    %c0_i32_1 = arith.constant 0 : i32
    return %c0_i32, %c0_i32_0 : i32, i32
  }
  func.func @transform_8(%arg0: i32, %arg1: i32) -> (i32, i32) {
    %c0_i32 = arith.constant 0 : i32
    %c0_i32_0 = arith.constant 0 : i32
    %c0_i32_1 = arith.constant 0 : i32
    return %c0_i32, %c0_i32_0 : i32, i32
  }
  func.func @transform_9(%arg0: i32, %arg1: i32) -> (i32, i32) {
    %c0_i32 = arith.constant 0 : i32
    %c0_i32_0 = arith.constant 0 : i32
    %c0_i32_1 = arith.constant 0 : i32
    return %c0_i32, %c0_i32_0 : i32, i32
  }
  func.func @transform_10(%arg0: i32, %arg1: i32) -> (i32, i32) {
    %c0_i32 = arith.constant 0 : i32
    %c0_i32_0 = arith.constant 0 : i32
    return %arg0, %c0_i32 : i32, i32
  }
}

</mosaic_0001>

<bundles_post_ra>
// kernel: gin0_forward.7
= control target key start
LH: loop header
LB: loop body
LE: loop exit
PB: predicated region body
PF: predicated region fallthrough
CT: control target
= control target key end

     0   :  { %v577_v2 = vmov 0.0   ;;  %vm578_vm0 = vmmov 0   ;;  %s801_s0 = inlined_call_operand.vmem [shape: f32[8,128], index: 0, kind: input, shape index: {}]   ;;  %s802_s1 = inlined_call_operand.vmem [shape: bf16[128,128], index: 1, kind: input, shape index: {}]   ;;  %s803_s2 = inlined_call_operand.vmem [shape: f32[128,128], index: 2, kind: input, shape index: {}]   ;;  %s804_s3 = inlined_call_operand.vmem [shape: f32[1,128], index: 3, kind: input, shape index: {}]   ;;  %s805_s4 = inlined_call_operand.vmem [shape: f32[128,128], index: 4, kind: input, shape index: {}]   ;;  %s806_s5 = inlined_call_operand.vmem [shape: f32[1,128], index: 5, kind: input, shape index: {}]   ;;  %s807_s6 = inlined_call_operand.hbm [shape: f32[8,128], index: 6, kind: output, shape index: {}]  }
   0x1   :  { %v391_v0 = vld [vmem:[%s802_s1 + $0x38] sm:$0xff]   ;;  %v390_v1 = vld [vmem:[%s802_s1 + $0x30] sm:$0xff]   ;;  %443 = vmatprep.subr.mxu0 %v577_v2  ;;  %475 = vmatprep.mubr.msk.f32.mxu0 %vm578_vm0, %v577_v2  ;;  %v389_v8 = vld [vmem:[%s802_s1 + $0x28] sm:$0xff]  }
   0x2   :  { %v383_v3 = vunpack.c.l.bf16 %v391_v0  ;;  %v384_v4 = vunpack.c.h.bf16 %v391_v0  ;;  %478 = vmatprep.subr.mxu1 %v577_v2  ;;  %510 = vmatprep.mubr.msk.f32.mxu1 %vm578_vm0, %v577_v2  ;;  %v380_v5 = vunpack.c.h.bf16 %v390_v1  ;;  %v154_v6 = vld [vmem:[%s803_s2 + $0x78] sm:$0xff]  ;;  %v153_v7 = vld [vmem:[%s803_s2 + $0x70] sm:$0xff]  ;;  %v379_v9 = vunpack.c.l.bf16 %v390_v1  ;;  %v152_v10 = vld [vmem:[%s803_s2 + $0x68] sm:$0xff] }
   0x3   :  { %479 = vmatpush3.msra.mxu1 %v154_v6  ;;  %v376_v11 = vunpack.c.h.bf16 %v389_v8  ;;  %v151_v12 = vld [vmem:[%s803_s2 + $0x60] sm:$0xff] }
   0x4   :  { %444 = vmatpush3.msra.mxu0 %v384_v4  ;;  %480 = vmatprep.subr.mxu1 %v577_v2  ;;  %v388_v13 = vld [vmem:[%s802_s1 + $0x20] sm:$0xff]  }
   0x5   :  { %445 = vmatprep.subr.mxu0 %v577_v2  ;;  %481 = vmatpush3.msra.mxu1 %v153_v7 }
   0x6   :  { %446 = vmatpush3.msra.mxu0 %v383_v3  ;;  %482 = vmatprep.subr.mxu1 %v577_v2 }
   0x7   :  { %447 = vmatprep.subr.mxu0 %v577_v2  ;;  %483 = vmatpush3.msra.mxu1 %v152_v10 }
   0x8   :  { %448 = vmatpush3.msra.mxu0 %v380_v5 }
   0x9   :  { %449 = vmatprep.subr.mxu0 %v577_v2 }
   0xa   :  { %11 = vsyncpa [#allocation4], 0  ;;  %450 = vmatpush3.msra.mxu0 %v379_v9  ;;  %v375_v14 = vunpack.c.l.bf16 %v389_v8  ;;  %484 = vmatprep.subr.mxu1 %v577_v2  ;;  %v150_v15 = vld [vmem:[%s803_s2 + $0x58] sm:$0xff]  ;;  %v372_v16 = vunpack.c.h.bf16 %v388_v13  ;;  %v149_v17 = vld [vmem:[%s803_s2 + $0x50] sm:$0xff]  ;;  %v371_v19 = vunpack.c.l.bf16 %v388_v13 }
   0xb   :  { %451 = vmatprep.subr.mxu0 %v577_v2  ;;  %485 = vmatpush3.msra.mxu1 %v151_v12  ;;  %v387_v18 = vld [vmem:[%s802_s1 + $0x18] sm:$0xff]   ;;  %v148_v20 = vld [vmem:[%s803_s2 + $0x48] sm:$0xff]  ;;  %v147_v22 = vld [vmem:[%s803_s2 + $0x40] sm:$0xff] }
   0xc   :  { %452 = vmatpush3.msra.mxu0 %v376_v11  ;;  %486 = vmatprep.subr.mxu1 %v577_v2  ;;  %v368_v21 = vunpack.c.h.bf16 %v387_v18  ;;  %v386_v23 = vld [vmem:[%s802_s1 + $0x10] sm:$0xff]   ;;  %v367_v24 = vunpack.c.l.bf16 %v387_v18  ;;  %v146_v25 = vld [vmem:[%s803_s2 + $0x38] sm:$0xff]  ;;  %v385_v28 = vld [vmem:[%s802_s1 + $0x8] sm:$0xff]  }
   0xd   :  { %453 = vmatprep.subr.mxu0 %v577_v2  ;;  %487 = vmatpush3.msra.mxu1 %v150_v15  ;;  %v364_v26 = vunpack.c.h.bf16 %v386_v23  ;;  %v145_v27 = vld [vmem:[%s803_s2 + $0x30] sm:$0xff]  ;;  %v363_v29 = vunpack.c.l.bf16 %v386_v23  ;;  %v144_v30 = vld [vmem:[%s803_s2 + $0x28] sm:$0xff]  ;;  %v360_v31 = vunpack.c.h.bf16 %v385_v28  ;;  %v143_v32 = vld [vmem:[%s803_s2 + $0x20] sm:$0xff]  ;;  %v359_v34 = vunpack.c.l.bf16 %v385_v28 }
   0xe   :  { %454 = vmatpush3.msra.mxu0 %v375_v14  ;;  %488 = vmatprep.subr.mxu1 %v577_v2  ;;  %v354_v33 = vld [vmem:[%s802_s1] sm:$0xff]   ;;  %v142_v35 = vld [vmem:[%s803_s2 + $0x18] sm:$0xff]  ;;  %v141_v37 = vld [vmem:[%s803_s2 + $0x10] sm:$0xff] }
   0xf   :  { %455 = vmatprep.subr.mxu0 %v577_v2  ;;  %489 = vmatpush3.msra.mxu1 %v149_v17  ;;  %v356_v36 = vunpack.c.h.bf16 %v354_v33  ;;  %v355_v38 = vunpack.c.l.bf16 %v354_v33  ;;  %v140_v39 = vld [vmem:[%s803_s2 + $0x8] sm:$0xff]  ;;  %v30_v40 = vld [vmem:[%s801_s0] sm:$0xff]  ;;  %v248_v42 = vld [vmem:[%s805_s4 + $0x78] sm:$0xff] }
  0x10   :  { %456 = vmatpush3.msra.mxu0 %v372_v16  ;;  %490 = vmatprep.subr.mxu1 %v577_v2  ;;  %v139_v41 = vld [vmem:[%s803_s2] sm:$0xff]  ;;  %v247_v43 = vld [vmem:[%s805_s4 + $0x70] sm:$0xff]  ;;  %v246_v44 = vld [vmem:[%s805_s4 + $0x68] sm:$0xff] }
  0x11   :  { %457 = vmatprep.subr.mxu0 %v577_v2  ;;  %491 = vmatpush3.msra.mxu1 %v148_v20  ;;  %v245_v45 = vld [vmem:[%s805_s4 + $0x60] sm:$0xff]  ;;  %v244_v46 = vld [vmem:[%s805_s4 + $0x58] sm:$0xff]  ;;  %v243_v47 = vld [vmem:[%s805_s4 + $0x50] sm:$0xff] }
  0x12   :  { %458 = vmatpush3.msra.mxu0 %v371_v19  ;;  %492 = vmatprep.subr.mxu1 %v577_v2  ;;  %v242_v48 = vld [vmem:[%s805_s4 + $0x48] sm:$0xff]  ;;  %v241_v49 = vld [vmem:[%s805_s4 + $0x40] sm:$0xff]  ;;  %v240_v50 = vld [vmem:[%s805_s4 + $0x38] sm:$0xff] }
  0x13   :  { %459 = vmatprep.subr.mxu0 %v577_v2  ;;  %493 = vmatpush3.msra.mxu1 %v147_v22  ;;  %v239_v51 = vld [vmem:[%s805_s4 + $0x30] sm:$0xff]  ;;  %v238_v52 = vld [vmem:[%s805_s4 + $0x28] sm:$0xff]  ;;  %v237_v53 = vld [vmem:[%s805_s4 + $0x20] sm:$0xff] }
  0x14   :  { %460 = vmatpush3.msra.mxu0 %v368_v21  ;;  %494 = vmatprep.subr.mxu1 %v577_v2  ;;  %v236_v54 = vld [vmem:[%s805_s4 + $0x18] sm:$0xff]  ;;  %v235_v57 = vld [vmem:[%s805_s4 + $0x10] sm:$0xff]  ;;  %v234_v58 = vld [vmem:[%s805_s4 + $0x8] sm:$0xff] }
  0x15   :  { %461 = vmatprep.subr.mxu0 %v577_v2  ;;  %495 = vmatpush3.msra.mxu1 %v146_v25  ;;  %v233_v59 = vld [vmem:[%s805_s4] sm:$0xff] }
  0x16   :  { %462 = vmatpush3.msra.mxu0 %v367_v24  ;;  %496 = vmatprep.subr.mxu1 %v577_v2  ;;  %v351_v60 = vld [vmem:[%s804_s3] ss:$0 sm:$0xff]  ;;  %s579_s3 = smov [#allocation3]  }
  0x17   :  { %463 = vmatprep.subr.mxu0 %v577_v2  ;;  %497 = vmatpush3.msra.mxu1 %v145_v27  ;;  %v352_v1 = vld [vmem:[%s806_s5] ss:$0 sm:$0xff]  ;;  %s343_s4 = sshll.u32 %s579_s3, 4  ;;  %s344_s4 = int_to_ptr.vmem [resolvable:$true] %s343_s4 }
  0x18   :  { %464 = vmatpush3.msra.mxu0 %v364_v26  ;;  %498 = vmatprep.subr.mxu1 %v577_v2  ;;  %s555_s5 = scalar_lea.vmem %s344_s4, 128  ;;  %p560_p1 = scmp.lt.s32.totalorder %s344_s4, %s344_s4 }
  0x19   :  { %465 = vmatprep.subr.mxu0 %v577_v2  ;;  %499 = vmatpush3.msra.mxu1 %v144_v30  ;;  %p556_p0 = scmp.ne.s32.totalorder %s344_s4, %s555_s5  ;;  %p561_p2 = scmp.lt.s32.totalorder %s555_s5, %s555_s5 }
  0x1a   :  { %466 = vmatpush3.msra.mxu0 %v363_v29  ;;  %500 = vmatprep.subr.mxu1 %v577_v2 }
  0x1b   :  { %467 = vmatprep.subr.mxu0 %v577_v2  ;;  %501 = vmatpush3.msra.mxu1 %v143_v32  ;;  %p562_p3 = por %p561_p2, %p560_p1 }
  0x1c   :  { %468 = vmatpush3.msra.mxu0 %v360_v31  ;;  %502 = vmatprep.subr.mxu1 %v577_v2 }
  0x1d   :  { %469 = vmatprep.subr.mxu0 %v577_v2  ;;  %503 = vmatpush3.msra.mxu1 %v142_v35  ;;  %p563_p4 = pnand %p562_p3, %p556_p0 }
  0x1e   :  { %470 = vmatpush3.msra.mxu0 %v359_v34  ;;  %504 = vmatprep.subr.mxu1 %v577_v2 }
  0x1f   :  { %471 = vmatprep.subr.mxu0 %v577_v2  ;;  %505 = vmatpush3.msra.mxu1 %v141_v37 }
  0x20   :  { %472 = vmatpush3.msra.mxu0 %v356_v36  ;;  %506 = vmatprep.subr.mxu1 %v577_v2 }
  0x21   :  { %473 = vmatprep.subr.mxu0 %v577_v2  ;;  %507 = vmatpush3.msra.mxu1 %v140_v39 }
  0x22   :  { %474 = vmatpush3.msra.mxu0 %v355_v38  ;;  %508 = vmatprep.subr.mxu1 %v577_v2 }
  0x23   :  { %476 = vmatmul.mubr.f32.vlgmr.msra.gmra.mxu0 %v30_v40  ;;  %513 = vmatprep.subr.mxu0 %v577_v2 }
  0x24   :  { %545 = vmatprep.mubr.msk.f32.mxu0 %vm578_vm0, %v577_v2  ;;  %509 = vmatpush3.msra.mxu1 %v139_v41 }
  0x25   :  { %514 = vmatpush3.msra.mxu0 %v248_v42 }
  0x26   :  { %515 = vmatprep.subr.mxu0 %v577_v2 }
  0x27   :  { %516 = vmatpush3.msra.mxu0 %v247_v43 }
  0x28   :  { %517 = vmatprep.subr.mxu0 %v577_v2 }
  0x29   :  { %518 = vmatpush3.msra.mxu0 %v246_v44 }
  0x2a   :  { %519 = vmatprep.subr.mxu0 %v577_v2 }
  0x2b   :  { %520 = vmatpush3.msra.mxu0 %v245_v45 }
  0x2c   :  { %521 = vmatprep.subr.mxu0 %v577_v2 }
  0x2d   :  { %522 = vmatpush3.msra.mxu0 %v244_v46 }
  0x2e   :  { %523 = vmatprep.subr.mxu0 %v577_v2 }
  0x2f   :  { %524 = vmatpush3.msra.mxu0 %v243_v47 }
  0x30   :  { %525 = vmatprep.subr.mxu0 %v577_v2 }
  0x31   :  { %526 = vmatpush3.msra.mxu0 %v242_v48 }
  0x32   :  { %527 = vmatprep.subr.mxu0 %v577_v2 }
  0x33   :  { %528 = vmatpush3.msra.mxu0 %v241_v49 }
  0x34   :  { %529 = vmatprep.subr.mxu0 %v577_v2 }
  0x35   :  { %530 = vmatpush3.msra.mxu0 %v240_v50 }
  0x36   :  { %531 = vmatprep.subr.mxu0 %v577_v2 }
  0x37   :  { %532 = vmatpush3.msra.mxu0 %v239_v51 }
  0x38   :  { %533 = vmatprep.subr.mxu0 %v577_v2 }
  0x39   :  { %534 = vmatpush3.msra.mxu0 %v238_v52 }
  0x3a   :  { %535 = vmatprep.subr.mxu0 %v577_v2 }
  0x3b   :  { %536 = vmatpush3.msra.mxu0 %v237_v53 }
  0x3c   :  { %537 = vmatprep.subr.mxu0 %v577_v2 }
  0x3d   :  { %538 = vmatpush3.msra.mxu0 %v236_v54 }
  0x3e   :  { %539 = vmatprep.subr.mxu0 %v577_v2 }
  0x3f   :  { %540 = vmatpush3.msra.mxu0 %v235_v57 }
  0x40   :  { %541 = vmatprep.subr.mxu0 %v577_v2 }
  0x41   :  { %542 = vmatpush3.msra.mxu0 %v234_v58 }
  0x42   :  { %543 = vmatprep.subr.mxu0 %v577_v2 }
  0x43   :  { %544 = vmatpush3.msra.mxu0 %v233_v59 }
  0xe3   :  { %v129_v55 = vpop.f32.mrf.mxu0 }
  0xe4   :  { %511 = vmatmul.mubr.f32.vlgmr.msra.gmra.mxu1 %v129_v55 }
  0xe5   :  { %v477_v56 = vpop.f32.mrf.mxu0 }
 0x1a4   :  { %v228_v61 = vpop.f32.mrf.mxu1 }
 0x1a5   :  { %v229_v62 = vadd.f32 %v351_v60, %v228_v61 }
 0x1a6   :  { %v512_v63 = vpop.f32.mrf.mxu1 }
 0x1a7   :  { %v232_v0 = vmax.f32 %v229_v62, 0.0 }
 0x1a9   :  { %546 = vmatmul.mubr.f32.vlgmr.msra.gmra.mxu0 %v232_v0 }
 0x269   :  { %v322_v3 = vpop.f32.mrf.mxu0 }
 0x26a   :  { %v323_v2 = vadd.f32 %v352_v1, %v322_v3 }
 0x26b   :  { %v547_v4 = vpop.f32.mrf.mxu0 }
 0x26c   :  { %326 = vmax.xlane.f32.xlu0 %v323_v2 }
 0x2f5   :  { %v327_v5 = vpop.xlane.xlu0 %326 }
 0x2f6   :  { %v328_v6 = vsub.f32 %v323_v2, %v327_v5 }
 0x2f8   :  { %v329_v7 = vmul.f32 1.442695, %v328_v6 }
 0x2fa   :  { %551 = vpow2.f32 %v329_v7 }
 0x307   :  { %v552_v8 = vpop.eup %551 }
 0x308   :  { %331 = vadd.xlane.f32.xlu0 %v552_v8 }
 0x391   :  { %v332_v9 = vpop.xlane.xlu0 %331 }
 0x392   :  { %553 = vlog2.f32 %v332_v9 }
 0x39f   :  { %v554_v10 = vpop.eup %553 }
 0x3a0   :  { %v334_v11 = vmul.f32 0.6931472, %v554_v10 }
 0x3a2   :  { %v335_v12 = vsub.f32 %v328_v6, %v334_v11 }
 0x3a4   :  { %336 = vst [vmem:[#allocation3] sm:$0xff] %v335_v12 }
 0x3a5   :  { %566 = shalt.err (!%p563_p4)
}
 0x3a6   :  { %346 = dma.vmem_to_hbm [thread:$0]  %s344_s4, 128, %s807_s6, [#allocation4]  }
 0x3a7   :  { %575 = dma.done.wait [#allocation4], 128  }
 0x3a8   :  { %576 = vsyncadd [#allocation4], 4294967168 }
 0x3a9   :  { %350 = vsyncpa [#allocation4], 1 }

// kernel: gin0_forward.4
= control target key start
LH: loop header
LB: loop body
LE: loop exit
PB: predicated region body
PF: predicated region fallthrough
CT: control target
= control target key end

     0   :  { %16 = vsyncpa [#allocation5], 0  ;;  %s1348_s13 = smov [#allocation4]   ;;  %s1712_s0 = inlined_call_operand.<no memory space> [shape: f32[1], index: 0, kind: input, shape index: {}]   ;;  %s1713_s1 = inlined_call_operand.vmem [shape: bf16[128,128], index: 1, kind: input, shape index: {}]   ;;  %s1714_s2 = inlined_call_operand.vmem [shape: bf16[128,128], index: 2, kind: input, shape index: {}, may-alias: {2,3}]   ;;  %s1715_s3 = inlined_call_operand.vmem [shape: bf16[128,128], index: 3, kind: input, shape index: {}, may-alias: {2,3}]   ;;  %s1716_s4 = inlined_call_operand.vmem [shape: f32[128,128], index: 4, kind: input, shape index: {}]   ;;  %s1717_s5 = inlined_call_operand.vmem [shape: f32[1,128], index: 5, kind: input, shape index: {}]   ;;  %s1718_s6 = inlined_call_operand.hbm [shape: f32[128,128], index: 6, kind: input, shape index: {}]   ;;  %s1719_s7 = inlined_call_operand.vmem [shape: f32[1,128], index: 7, kind: input, shape index: {}]   ;;  %s1720_s8 = inlined_call_operand.vmem [shape: f32[1,128], index: 8, kind: input, shape index: {}]   ;;  %s1721_s9 = inlined_call_operand.vmem [shape: f32[1,128], index: 9, kind: input, shape index: {}]   ;;  %s1722_s10 = inlined_call_operand.vmem [shape: bf16[128,128], index: 10, kind: output, shape index: {}]  }
   0x1   :  { %s34_s14 = sshll.u32 %s1348_s13, 4  ;;  %s35_s14 = int_to_ptr.vmem [resolvable:$true] %s34_s14 }
   0x2   :  { %s1334_s15 = scalar_lea.vmem %s35_s14, 2048  ;;  %p1339_p1 = scmp.lt.s32.totalorder %s35_s14, %s35_s14 }
   0x3   :  { %p1335_p0 = scmp.ne.s32.totalorder %s35_s14, %s1334_s15  ;;  %p1340_p2 = scmp.lt.s32.totalorder %s1334_s15, %s1334_s15 }
   0x5   :  { %p1341_p3 = por %p1340_p2, %p1339_p1 }
   0x7   :  { %p1342_p4 = pnand %p1341_p3, %p1335_p0 }
   0x9   :  { %1345 = shalt.err (!%p1342_p4)
}
   0xa   :  { %s1349_s16 = smov 128   ;;  %s1350_s17 = smov 8  }
   0xb   :  { %40 = dma.hbm_to_vmem [thread:$0]  %s1718_s6, 2048, %s35_s14, [#allocation5], %s1349_s16, %s1349_s16, %s1350_s17  }
   0xc   :  { %1346 = dma.done.wait [#allocation5], 2048  }
   0xd   :  { %1347 = vsyncadd [#allocation5], 4294965248  ;;  %v1310_v0 = vld [vmem:[%s1714_s2 + $0x38] sm:$0xff]   ;;  %v1311_v1 = vld [vmem:[%s1714_s2 + $0x30] sm:$0xff]   ;;  %s56_s21 = sadd.f32 1.0, %s1712_s0 }
   0xe   :  { %1131 = vmatprep.subr.bf16.mxu0 %v1310_v0  ;;  %v1312_v2 = vld [vmem:[%s1714_s2 + $0x28] sm:$0xff]   ;;  %v1313_v3 = vld [vmem:[%s1714_s2 + $0x20] sm:$0xff]   ;;  %v1314_v5 = vld [vmem:[%s1714_s2 + $0x18] sm:$0xff]  }
   0xf   :  { %1132 = vmatpush3.bf16.msra.mxu0 %v1310_v0  ;;  %v1318_v4 = vld [vmem:[%s1713_s1] sm:$0xff]   ;;  %v1315_v6 = vld [vmem:[%s1714_s2 + $0x10] sm:$0xff]   ;;  %v429_v7 = vld [vmem:[%s1716_s4 + $0x78] sm:$0xff]  ;;  %v1563_v47 = vstv %s56_s21 }
  0x10   :  { %1133 = vmatprep.subr.bf16.mxu0 %v1311_v1  ;;  %1147 = vmatprep.mubr.bf16.mxu0 %v1318_v4  ;;  %v428_v8 = vld [vmem:[%s1716_s4 + $0x70] sm:$0xff]  ;;  %v427_v9 = vld [vmem:[%s1716_s4 + $0x68] sm:$0xff]  ;;  %v426_v11 = vld [vmem:[%s1716_s4 + $0x60] sm:$0xff] }
  0x11   :  { %1163 = vmatprep.subr.mxu1 %v429_v7  ;;  %v1316_v10 = vld [vmem:[%s1714_s2 + $0x8] sm:$0xff]   ;;  %v425_v12 = vld [vmem:[%s1716_s4 + $0x58] sm:$0xff]  ;;  %v1317_v13 = vld [vmem:[%s1714_s2] sm:$0xff]  }
  0x12   :  { %1164 = vmatpush3.msra.mxu1 %v429_v7  ;;  %v424_v14 = vld [vmem:[%s1716_s4 + $0x50] sm:$0xff]  ;;  %v423_v15 = vld [vmem:[%s1716_s4 + $0x48] sm:$0xff]  ;;  %v422_v16 = vld [vmem:[%s1716_s4 + $0x40] sm:$0xff] }
  0x13   :  { %1134 = vmatpush3.bf16.msra.mxu0 %v1311_v1  ;;  %1165 = vmatprep.subr.mxu1 %v428_v8  ;;  %v1319_v17 = vld [vmem:[%s1713_s1 + $0x8] sm:$0xff]   ;;  %v421_v18 = vld [vmem:[%s1716_s4 + $0x38] sm:$0xff]  ;;  %v1320_v19 = vld [vmem:[%s1713_s1 + $0x10] sm:$0xff]  }
  0x14   :  { %1135 = vmatprep.subr.bf16.mxu0 %v1312_v2  ;;  %1166 = vmatpush3.msra.mxu1 %v428_v8  ;;  %v420_v20 = vld [vmem:[%s1716_s4 + $0x30] sm:$0xff]  ;;  %v419_v21 = vld [vmem:[%s1716_s4 + $0x28] sm:$0xff]  ;;  %v418_v22 = vld [vmem:[%s1716_s4 + $0x20] sm:$0xff] }
  0x15   :  { %1167 = vmatprep.subr.mxu1 %v427_v9  ;;  %v1321_v23 = vld [vmem:[%s1713_s1 + $0x18] sm:$0xff]   ;;  %v1322_v24 = vld [vmem:[%s1713_s1 + $0x20] sm:$0xff]   ;;  %v1323_v25 = vld [vmem:[%s1713_s1 + $0x28] sm:$0xff]  }
  0x16   :  { %1168 = vmatpush3.msra.mxu1 %v427_v9  ;;  %v1324_v26 = vld [vmem:[%s1713_s1 + $0x30] sm:$0xff]   ;;  %v1325_v27 = vld [vmem:[%s1713_s1 + $0x38] sm:$0xff]   ;;  %v415_v30 = vld [vmem:[%s1716_s4 + $0x8] sm:$0xff] }
  0x17   :  { %1136 = vmatpush3.bf16.msra.mxu0 %v1312_v2  ;;  %1169 = vmatprep.subr.mxu1 %v426_v11  ;;  %v417_v28 = vld [vmem:[%s1716_s4 + $0x18] sm:$0xff]  ;;  %v416_v29 = vld [vmem:[%s1716_s4 + $0x10] sm:$0xff]  ;;  %v414_v31 = vld [vmem:[%s1716_s4] sm:$0xff] }
  0x18   :  { %1137 = vmatprep.subr.bf16.mxu0 %v1313_v3  ;;  %1170 = vmatpush3.msra.mxu1 %v426_v11  ;;  %v1505_v32 = vld [vmem:[#allocation4 + $0x78] sm:$0xff]  ;;  %v1507_v33 = vld [vmem:[#allocation4 + $0x70] sm:$0xff]  ;;  %v1512_v34 = vld [vmem:[#allocation4 + $0x68] sm:$0xff] }
  0x19   :  { %1171 = vmatprep.subr.mxu1 %v425_v12  ;;  %v1516_v35 = vld [vmem:[#allocation4 + $0x60] sm:$0xff]  ;;  %v1520_v36 = vld [vmem:[#allocation4 + $0x58] sm:$0xff]  ;;  %v1524_v37 = vld [vmem:[#allocation4 + $0x50] sm:$0xff] }
  0x1a   :  { %1172 = vmatpush3.msra.mxu1 %v425_v12  ;;  %v1528_v38 = vld [vmem:[#allocation4 + $0x48] sm:$0xff]  ;;  %v1532_v39 = vld [vmem:[#allocation4 + $0x40] sm:$0xff]  ;;  %v1536_v40 = vld [vmem:[#allocation4 + $0x38] sm:$0xff] }
  0x1b   :  { %1138 = vmatpush3.bf16.msra.mxu0 %v1313_v3  ;;  %1173 = vmatprep.subr.mxu1 %v424_v14  ;;  %v1540_v41 = vld [vmem:[#allocation4 + $0x30] sm:$0xff]  ;;  %v1544_v42 = vld [vmem:[#allocation4 + $0x28] sm:$0xff]  ;;  %v1548_v43 = vld [vmem:[#allocation4 + $0x20] sm:$0xff] }
  0x1c   :  { %1139 = vmatprep.subr.bf16.mxu0 %v1314_v5  ;;  %1174 = vmatpush3.msra.mxu1 %v424_v14  ;;  %v966_v44 = vld [vmem:[%s1715_s3] sm:$0xff]   ;;  %v1037_v46 = vld [vmem:[%s1715_s3 + $0x8] sm:$0xff]   ;;  %v1038_v52 = vld [vmem:[%s1715_s3 + $0x10] sm:$0xff]  }
  0x1d   :  { %1175 = vmatprep.subr.mxu1 %v423_v15  ;;  %v967_v45 = vunpack.c.l.bf16 %v966_v44  ;;  %v968_v49 = vunpack.c.h.bf16 %v966_v44  ;;  %v971_v50 = vunpack.c.l.bf16 %v1037_v46  ;;  %v972_v54 = vunpack.c.h.bf16 %v1037_v46  ;;  %v1039_v60 = vld [vmem:[%s1715_s3 + $0x18] sm:$0xff]   ;;  %v1041_v14 = vld [vmem:[%s1715_s3 + $0x28] sm:$0xff]  }
  0x1e   :  { %1176 = vmatpush3.msra.mxu1 %v423_v15  ;;  %v975_v57 = vunpack.c.l.bf16 %v1038_v52  ;;  %v976_v1 = vunpack.c.h.bf16 %v1038_v52  ;;  %v979_v3 = vunpack.c.l.bf16 %v1039_v60  ;;  %v980_v7 = vunpack.c.h.bf16 %v1039_v60 }
  0x1f   :  { %1140 = vmatpush3.bf16.msra.mxu0 %v1314_v5  ;;  %1177 = vmatprep.subr.mxu1 %v422_v16  ;;  %v90_v48 = vmul.f32 %v967_v45, %v1563_v47  ;;  %v91_v56 = vmul.f32 %v968_v49, %v1563_v47  ;;  %v92_v58 = vmul.f32 %v971_v50, %v1563_v47  ;;  %v1040_v5 = vld [vmem:[%s1715_s3 + $0x20] sm:$0xff]  }
  0x20   :  { %1141 = vmatprep.subr.bf16.mxu0 %v1315_v6  ;;  %1178 = vmatpush3.msra.mxu1 %v422_v16  ;;  %v93_v62 = vmul.f32 %v972_v54, %v1563_v47  ;;  %v94_v0 = vmul.f32 %v975_v57, %v1563_v47  ;;  %v983_v11 = vunpack.c.l.bf16 %v1040_v5  ;;  %v96_v12 = vmul.f32 %v979_v3, %v1563_v47  ;;  %v600_v57 = vld [vmem:[#allocation4 + $0x10] sm:$0xff] }
  0x21   :  { %1179 = vmatprep.subr.mxu1 %v421_v18  ;;  %v97_v16 = vmul.f32 %v980_v7, %v1563_v47 }
  0x22   :  { %1180 = vmatpush3.msra.mxu1 %v421_v18  ;;  %v98_v18 = vmul.f32 %v983_v11, %v1563_v47 }
  0x23   :  { %1142 = vmatpush3.bf16.msra.mxu0 %v1315_v6  ;;  %1181 = vmatprep.subr.mxu1 %v420_v20 }
  0x24   :  { %1143 = vmatprep.subr.bf16.mxu0 %v1316_v10  ;;  %1182 = vmatpush3.msra.mxu1 %v420_v20 }
  0x25   :  { %1183 = vmatprep.subr.mxu1 %v419_v21 }
  0x26   :  { %1184 = vmatpush3.msra.mxu1 %v419_v21  ;;  %v987_v21 = vunpack.c.l.bf16 %v1041_v14 }
  0x27   :  { %1144 = vmatpush3.bf16.msra.mxu0 %v1316_v10  ;;  %1185 = vmatprep.subr.mxu1 %v418_v22  ;;  %v95_v10 = vmul.f32 %v976_v1, %v1563_v47 }
  0x28   :  { %1145 = vmatprep.subr.bf16.mxu0 %v1317_v13  ;;  %1186 = vmatpush3.msra.mxu1 %v418_v22 }
  0x29   :  { %1187 = vmatprep.subr.mxu1 %v417_v28 }
  0x2a   :  { %1188 = vmatpush3.msra.mxu1 %v417_v28 }
  0x2b   :  { %1146 = vmatpush3.bf16.msra.mxu0 %v1317_v13  ;;  %1189 = vmatprep.subr.mxu1 %v416_v29 }
  0x2c   :  { %1190 = vmatpush3.msra.mxu1 %v416_v29  ;;  %1219 = vmatprep.subr.mxu0 %v1505_v32 }
  0x2d   :  { %1191 = vmatprep.subr.mxu1 %v415_v30 }
  0x2e   :  { %1148 = vmatmul.mubr.bf16.vlgmr.msra.gmra.mxu0 %v1319_v17  ;;  %1192 = vmatpush3.msra.mxu1 %v415_v30  ;;  %v100_v30 = vmul.f32 %v987_v21, %v1563_v47 }
  0x2f   :  { %1151 = vmatprep.mubr.bf16.mxu0 %v1320_v19  ;;  %1193 = vmatprep.subr.mxu1 %v414_v31  ;;  %v984_v19 = vunpack.c.h.bf16 %v1040_v5 }
  0x30   :  { %1194 = vmatpush3.msra.mxu1 %v414_v31  ;;  %1220 = vmatpush3.msra.mxu0 %v1505_v32 }
  0x31   :  { %1275 = vmatprep.subr.mxu1 %v1505_v32  ;;  %1221 = vmatprep.subr.mxu0 %v1507_v33  ;;  %v99_v28 = vmul.f32 %v984_v19, %v1563_v47 }
  0x32   :  { %1222 = vmatpush3.msra.mxu0 %v1507_v33 }
  0x33   :  { %1223 = vmatprep.subr.mxu0 %v1512_v34 }
  0x34   :  { %1224 = vmatpush3.msra.mxu0 %v1512_v34 }
  0x35   :  { %1225 = vmatprep.subr.mxu0 %v1516_v35 }
  0x36   :  { %1152 = vmatmul.mubr.bf16.gmra.mxu0 %v1321_v23  ;;  %v1042_v23 = vld [vmem:[%s1715_s3 + $0x30] sm:$0xff]  }
  0x37   :  { %1155 = vmatprep.mubr.bf16.mxu0 %v1322_v24  ;;  %1226 = vmatpush3.msra.mxu0 %v1516_v35  ;;  %v991_v29 = vunpack.c.l.bf16 %v1042_v23  ;;  %v992_v44 = vunpack.c.h.bf16 %v1042_v23 }
  0x38   :  { %1227 = vmatprep.subr.mxu0 %v1520_v36 }
  0x39   :  { %1228 = vmatpush3.msra.mxu0 %v1520_v36 }
  0x3a   :  { %1229 = vmatprep.subr.mxu0 %v1524_v37 }
  0x3b   :  { %1230 = vmatpush3.msra.mxu0 %v1524_v37 }
  0x3c   :  { %1231 = vmatprep.subr.mxu0 %v1528_v38 }
  0x3d   :  { %1232 = vmatpush3.msra.mxu0 %v1528_v38 }
  0x3e   :  { %1156 = vmatmul.mubr.bf16.gmra.mxu0 %v1323_v25  ;;  %1233 = vmatprep.subr.mxu0 %v1532_v39  ;;  %v988_v25 = vunpack.c.h.bf16 %v1041_v14 }
  0x3f   :  { %1159 = vmatprep.mubr.bf16.mxu0 %v1324_v26  ;;  %1234 = vmatpush3.msra.mxu0 %v1532_v39 }
  0x40   :  { %1235 = vmatprep.subr.mxu0 %v1536_v40 }
  0x41   :  { %1236 = vmatpush3.msra.mxu0 %v1536_v40 }
  0x42   :  { %1237 = vmatprep.subr.mxu0 %v1540_v41 }
  0x43   :  { %1238 = vmatpush3.msra.mxu0 %v1540_v41 }
  0x44   :  { %1239 = vmatprep.subr.mxu0 %v1544_v42 }
  0x45   :  { %1240 = vmatpush3.msra.mxu0 %v1544_v42 }
  0x46   :  { %1160 = vmatmul.mubr.bf16.gmra.mxu0 %v1325_v27  ;;  %1241 = vmatprep.subr.mxu0 %v1548_v43 }
  0x47   :  { %1242 = vmatpush3.msra.mxu0 %v1548_v43 }
  0xee   :  { %v1149_v51 = vpop.f32.mrf.mxu0 }
  0xef   :  { %v365_v2 = vadd.f32 %v1149_v51, %v92_v58  ;;  %v103_v51 = vmul.f32 %v992_v44, %v1563_v47 }
  0xf0   :  { %v300_v53 = vpop.f32.mrf.mxu0 }
  0xf1   :  { %v363_v55 = vadd.f32 %v300_v53, %v90_v48 }
  0xf2   :  { %v1150_v59 = vpop.f32.mrf.mxu0 }
  0xf3   :  { %1195 = vmatprep.mubr.f32.mxu1 %v363_v55  ;;  %v366_v8 = vadd.f32 %v1150_v59, %v93_v62 }
  0xf4   :  { %v303_v61 = vpop.f32.mrf.mxu0 }
  0xf5   :  { %v364_v63 = vadd.f32 %v303_v61, %v91_v56 }
  0xf6   :  { %v1153_v4 = vpop.f32.mrf.mxu0 }
  0xf7   :  { %1196 = vmatmul.mubr.f32.vlgmr.msra.gmra.mxu1 %v364_v63  ;;  %v369_v20 = vadd.f32 %v1153_v4, %v96_v12 }
  0xf8   :  { %v316_v6 = vpop.f32.mrf.mxu0  ;;  %1198 = vmatprep.mubr.f32.mxu1 %v365_v2  ;;  %1291 = vmatpush3.msra.mxu1 %v1505_v32  ;;  %v1043_v32 = vld [vmem:[%s1715_s3 + $0x38] sm:$0xff]  }
  0xf9   :  { %v367_v9 = vadd.f32 %v316_v6, %v94_v0  ;;  %1276 = vmatprep.subr.mxu1 %v1507_v33  ;;  %v995_v45 = vunpack.c.l.bf16 %v1043_v32  ;;  %v996_v50 = vunpack.c.h.bf16 %v1043_v32 }
  0xfa   :  { %v1154_v13 = vpop.f32.mrf.mxu0  ;;  %1292 = vmatpush3.msra.mxu1 %v1507_v33 }
  0xfb   :  { %1199 = vmatmul.mubr.f32.gmra.mxu1 %v366_v8  ;;  %1277 = vmatprep.subr.mxu1 %v1512_v34  ;;  %v370_v26 = vadd.f32 %v1154_v13, %v97_v16  ;;  %v104_v52 = vmul.f32 %v995_v45, %v1563_v47 }
  0xfc   :  { %v319_v15 = vpop.f32.mrf.mxu0  ;;  %1201 = vmatprep.mubr.f32.mxu1 %v367_v9  ;;  %1293 = vmatpush3.msra.mxu1 %v1512_v34  ;;  %v101_v34 = vmul.f32 %v988_v25, %v1563_v47 }
  0xfd   :  { %v368_v17 = vadd.f32 %v319_v15, %v95_v10  ;;  %1278 = vmatprep.subr.mxu1 %v1516_v35 }
  0xfe   :  { %v1157_v22 = vpop.f32.mrf.mxu0  ;;  %1294 = vmatpush3.msra.mxu1 %v1516_v35 }
  0xff   :  { %1202 = vmatmul.mubr.f32.gmra.mxu1 %v368_v17  ;;  %1279 = vmatprep.subr.mxu1 %v1520_v36 }
 0x100   :  { %v332_v24 = vpop.f32.mrf.mxu0  ;;  %1204 = vmatprep.mubr.f32.mxu1 %v369_v20  ;;  %1295 = vmatpush3.msra.mxu1 %v1520_v36  ;;  %v102_v36 = vmul.f32 %v991_v29, %v1563_v47 }
 0x101   :  { %v371_v27 = vadd.f32 %v332_v24, %v98_v18  ;;  %1280 = vmatprep.subr.mxu1 %v1524_v37 }
 0x102   :  { %v1158_v31 = vpop.f32.mrf.mxu0  ;;  %1296 = vmatpush3.msra.mxu1 %v1524_v37  ;;  %v373_v37 = vadd.f32 %v1157_v22, %v100_v30 }
 0x103   :  { %1205 = vmatmul.mubr.f32.gmra.mxu1 %v370_v26  ;;  %1281 = vmatprep.subr.mxu1 %v1528_v38 }
 0x104   :  { %v335_v33 = vpop.f32.mrf.mxu0  ;;  %1207 = vmatprep.mubr.f32.mxu1 %v371_v27  ;;  %1297 = vmatpush3.msra.mxu1 %v1528_v38  ;;  %v374_v38 = vadd.f32 %v1158_v31, %v101_v34 }
 0x105   :  { %v372_v35 = vadd.f32 %v335_v33, %v99_v28  ;;  %1282 = vmatprep.subr.mxu1 %v1532_v39 }
 0x106   :  { %v1161_v46 = vpop.f32.mrf.mxu0  ;;  %1298 = vmatpush3.msra.mxu1 %v1532_v39 }
 0x107   :  { %1208 = vmatmul.mubr.f32.gmra.mxu1 %v372_v35  ;;  %1283 = vmatprep.subr.mxu1 %v1536_v40  ;;  %v377_v55 = vadd.f32 %v1161_v46, %v104_v52 }
 0x108   :  { %v348_v48 = vpop.f32.mrf.mxu0  ;;  %1210 = vmatprep.mubr.f32.mxu1 %v373_v37  ;;  %1299 = vmatpush3.msra.mxu1 %v1536_v40  ;;  %v105_v40 = vmul.f32 %v996_v50, %v1563_v47  ;;  %v598_v47 = vld [vmem:[#allocation4] sm:$0xff] }
 0x109   :  { %v375_v49 = vadd.f32 %v348_v48, %v102_v36  ;;  %1284 = vmatprep.subr.mxu1 %v1540_v41 }
 0x10a   :  { %v1162_v53 = vpop.f32.mrf.mxu0  ;;  %1300 = vmatpush3.msra.mxu1 %v1540_v41  ;;  %v601_v41 = vld [vmem:[#allocation4 + $0x18] sm:$0xff] }
 0x10b   :  { %1211 = vmatmul.mubr.f32.gmra.mxu1 %v374_v38  ;;  %1285 = vmatprep.subr.mxu1 %v1544_v42  ;;  %v378_v56 = vadd.f32 %v1162_v53, %v105_v40  ;;  %v1628_v38 = vld [vmem:[%s1719_s7] ss:$0 sm:$0xff] }
 0x10c   :  { %v351_v39 = vpop.f32.mrf.mxu0  ;;  %1213 = vmatprep.mubr.f32.mxu1 %v375_v49  ;;  %1301 = vmatpush3.msra.mxu1 %v1544_v42  ;;  %v599_v42 = vld [vmem:[#allocation4 + $0x8] sm:$0xff] }
 0x10d   :  { %v376_v54 = vadd.f32 %v351_v39, %v103_v51  ;;  %1286 = vmatprep.subr.mxu1 %v1548_v43  ;;  %1243 = vmatprep.subr.mxu0 %v601_v41  ;;  %v1634_v51 = vld [vmem:[%s1720_s8] ss:$0 sm:$0xff] }
 0x10e   :  { %1302 = vmatpush3.msra.mxu1 %v1548_v43  ;;  %1244 = vmatpush3.msra.mxu0 %v601_v41  ;;  %v929_v43 = vld [vmem:[%s1717_s5] ss:$0 sm:$0xff] }
 0x10f   :  { %1214 = vmatmul.mubr.f32.gmra.mxu1 %v376_v54  ;;  %1287 = vmatprep.subr.mxu1 %v601_v41 }
 0x110   :  { %1216 = vmatprep.mubr.f32.mxu1 %v377_v55  ;;  %1303 = vmatpush3.msra.mxu1 %v601_v41  ;;  %v1641_v55 = vld [vmem:[%s1721_s9] ss:$0 sm:$0xff] }
 0x111   :  { %1245 = vmatprep.subr.mxu0 %v600_v57  ;;  %1288 = vmatprep.subr.mxu1 %v600_v57 }
 0x112   :  { %1246 = vmatpush3.msra.mxu0 %v600_v57  ;;  %1304 = vmatpush3.msra.mxu1 %v600_v57 }
 0x113   :  { %1217 = vmatmul.mubr.f32.gmra.mxu1 %v378_v56  ;;  %1247 = vmatprep.subr.mxu0 %v599_v42 }
 0x114   :  { %1289 = vmatprep.subr.mxu1 %v599_v42  ;;  %1248 = vmatpush3.msra.mxu0 %v599_v42 }
 0x115   :  { %1305 = vmatpush3.msra.mxu1 %v599_v42  ;;  %1249 = vmatprep.subr.mxu0 %v598_v47 }
 0x116   :  { %1290 = vmatprep.subr.mxu1 %v598_v47  ;;  %1250 = vmatpush3.msra.mxu0 %v598_v47 }
 0x117   :  { %1306 = vmatpush3.msra.mxu1 %v598_v47 }
 0x1b7   :  { %v1197_v58 = vpop.f32.mrf.mxu1 }
 0x1b8   :  { %v509_v59 = vadd.f32 %v1197_v58, %v929_v43 }
 0x1b9   :  { %v503_v60 = vpop.f32.mrf.mxu1 }
 0x1ba   :  { %v504_v61 = vadd.f32 %v929_v43, %v503_v60  ;;  %v583_v0 = vmax.f32 %v509_v59, 0.0 }
 0x1bb   :  { %v1200_v62 = vpop.f32.mrf.mxu1 }
 0x1bc   :  { %v582_v63 = vmax.f32 %v504_v61, 0.0  ;;  %v519_v1 = vadd.f32 %v1200_v62, %v929_v43 }
 0x1bd   :  { %v513_v2 = vpop.f32.mrf.mxu1 }
 0x1be   :  { %v514_v3 = vadd.f32 %v929_v43, %v513_v2  ;;  %1251 = vmatprep.mubr.f32.mxu0 %v582_v63  ;;  %v585_v6 = vmax.f32 %v519_v1, 0.0 }
 0x1bf   :  { %v1203_v4 = vpop.f32.mrf.mxu1  ;;  %1252 = vmatmul.mubr.f32.vlgmr.msra.gmra.mxu0 %v583_v0 }
 0x1c0   :  { %v584_v5 = vmax.f32 %v514_v3, 0.0  ;;  %v529_v7 = vadd.f32 %v1203_v4, %v929_v43 }
 0x1c1   :  { %v523_v8 = vpop.f32.mrf.mxu1 }
 0x1c2   :  { %v524_v9 = vadd.f32 %v929_v43, %v523_v8  ;;  %1254 = vmatprep.mubr.f32.mxu0 %v584_v5  ;;  %v587_v12 = vmax.f32 %v529_v7, 0.0 }
 0x1c3   :  { %v1206_v10 = vpop.f32.mrf.mxu1  ;;  %1255 = vmatmul.mubr.f32.gmra.mxu0 %v585_v6 }
 0x1c4   :  { %v586_v11 = vmax.f32 %v524_v9, 0.0  ;;  %v539_v13 = vadd.f32 %v1206_v10, %v929_v43 }
 0x1c5   :  { %v533_v14 = vpop.f32.mrf.mxu1 }
 0x1c6   :  { %v534_v15 = vadd.f32 %v929_v43, %v533_v14  ;;  %1257 = vmatprep.mubr.f32.mxu0 %v586_v11  ;;  %v589_v18 = vmax.f32 %v539_v13, 0.0 }
 0x1c7   :  { %v1209_v16 = vpop.f32.mrf.mxu1  ;;  %1258 = vmatmul.mubr.f32.gmra.mxu0 %v587_v12 }
 0x1c8   :  { %v588_v17 = vmax.f32 %v534_v15, 0.0  ;;  %v549_v19 = vadd.f32 %v1209_v16, %v929_v43 }
 0x1c9   :  { %v543_v20 = vpop.f32.mrf.mxu1 }
 0x1ca   :  { %v544_v21 = vadd.f32 %v929_v43, %v543_v20  ;;  %1260 = vmatprep.mubr.f32.mxu0 %v588_v17  ;;  %v591_v24 = vmax.f32 %v549_v19, 0.0 }
 0x1cb   :  { %v1212_v22 = vpop.f32.mrf.mxu1  ;;  %1261 = vmatmul.mubr.f32.gmra.mxu0 %v589_v18 }
 0x1cc   :  { %v590_v23 = vmax.f32 %v544_v21, 0.0  ;;  %v559_v25 = vadd.f32 %v1212_v22, %v929_v43 }
 0x1cd   :  { %v553_v26 = vpop.f32.mrf.mxu1 }
 0x1ce   :  { %v554_v27 = vadd.f32 %v929_v43, %v553_v26  ;;  %1263 = vmatprep.mubr.f32.mxu1 %v590_v23  ;;  %v593_v30 = vmax.f32 %v559_v25, 0.0 }
 0x1cf   :  { %v1215_v28 = vpop.f32.mrf.mxu1  ;;  %1264 = vmatmul.mubr.f32.vlgmr.msra.gmra.mxu1 %v591_v24 }
 0x1d0   :  { %v592_v29 = vmax.f32 %v554_v27, 0.0  ;;  %v569_v31 = vadd.f32 %v1215_v28, %v929_v43 }
 0x1d1   :  { %v563_v32 = vpop.f32.mrf.mxu1 }
 0x1d2   :  { %v564_v33 = vadd.f32 %v929_v43, %v563_v32  ;;  %1266 = vmatprep.mubr.f32.mxu1 %v592_v29  ;;  %v595_v36 = vmax.f32 %v569_v31, 0.0 }
 0x1d3   :  { %v1218_v34 = vpop.f32.mrf.mxu1  ;;  %1267 = vmatmul.mubr.f32.gmra.mxu1 %v593_v30 }
 0x1d4   :  { %v594_v35 = vmax.f32 %v564_v33, 0.0  ;;  %v579_v44 = vadd.f32 %v1218_v34, %v929_v43 }
 0x1d5   :  { %v573_v37 = vpop.f32.mrf.mxu1 }
 0x1d6   :  { %v574_v45 = vadd.f32 %v929_v43, %v573_v37  ;;  %1269 = vmatprep.mubr.f32.mxu1 %v594_v35  ;;  %v597_v48 = vmax.f32 %v579_v44, 0.0 }
 0x1d7   :  { %1270 = vmatmul.mubr.f32.gmra.mxu1 %v595_v36 }
 0x1d8   :  { %v596_v46 = vmax.f32 %v574_v45, 0.0 }
 0x1da   :  { %1272 = vmatprep.mubr.f32.mxu1 %v596_v46 }
 0x1db   :  { %1273 = vmatmul.mubr.f32.gmra.mxu1 %v597_v48 }
 0x27f   :  { %v1253_v49 = vpop.f32.mrf.mxu0 }
 0x280   :  { %v693_v50 = vadd.f32 %v1253_v49, %v1628_v38 }
 0x281   :  { %v687_v52 = vpop.f32.mrf.mxu0 }
 0x282   :  { %v767_v53 = vmax.f32 %v693_v50, 0.0  ;;  %v688_v39 = vadd.f32 %v1628_v38, %v687_v52 }
 0x283   :  { %v1256_v40 = vpop.f32.mrf.mxu0 }
 0x284   :  { %v790_v54 = vmul.f32 %v1634_v51, %v767_v53  ;;  %v766_v56 = vmax.f32 %v688_v39, 0.0  ;;  %v703_v41 = vadd.f32 %v1256_v40, %v1628_v38 }
 0x285   :  { %v697_v57 = vpop.f32.mrf.mxu0 }
 0x286   :  { %v789_v42 = vmul.f32 %v1634_v51, %v766_v56  ;;  %v769_v47 = vmax.f32 %v703_v41, 0.0  ;;  %v698_v43 = vadd.f32 %v1628_v38, %v697_v57  ;;  %v813_v58 = vadd.f32 %v1641_v55, %v790_v54 }
 0x287   :  { %v1259_v59 = vpop.f32.mrf.mxu0 }
 0x288   :  { %v812_v60 = vadd.f32 %v1641_v55, %v789_v42  ;;  %v792_v61 = vmul.f32 %v1634_v51, %v769_v47  ;;  %v768_v62 = vmax.f32 %v698_v43, 0.0  ;;  %v713_v63 = vadd.f32 %v1259_v59, %v1628_v38 }
 0x289   :  { %v707_v0 = vpop.f32.mrf.mxu0 }
 0x28a   :  { %v1000_v1 = vpack.c.bf16 %v813_v58, %v812_v60  ;;  %v791_v2 = vmul.f32 %v1634_v51, %v768_v62  ;;  %v771_v3 = vmax.f32 %v713_v63, 0.0  ;;  %v708_v4 = vadd.f32 %v1628_v38, %v707_v0 }
 0x28b   :  { %v1262_v5 = vpop.f32.mrf.mxu0  ;;  %v815_v6 = vadd.f32 %v1641_v55, %v792_v61 }
 0x28c   :  { %1001 = vst [vmem:[%s1722_s10] sm:$0xff] %v1000_v1   ;;  %v814_v7 = vadd.f32 %v1641_v55, %v791_v2  ;;  %v723_v8 = vadd.f32 %v1262_v5, %v1628_v38  ;;  %v794_v9 = vmul.f32 %v1634_v51, %v771_v3  ;;  %v770_v10 = vmax.f32 %v708_v4, 0.0 }
 0x28d   :  { %v717_v11 = vpop.f32.mrf.mxu0 }
 0x28e   :  { %v1005_v12 = vpack.c.bf16 %v815_v6, %v814_v7  ;;  %v773_v13 = vmax.f32 %v723_v8, 0.0  ;;  %v718_v14 = vadd.f32 %v1628_v38, %v717_v11  ;;  %v793_v15 = vmul.f32 %v1634_v51, %v770_v10 }
 0x28f   :  { %v1265_v16 = vpop.f32.mrf.mxu1  ;;  %v817_v20 = vadd.f32 %v1641_v55, %v794_v9 }
 0x290   :  { %1044 = vst [vmem:[%s1722_s10 + $0x8] sm:$0xff] %v1005_v12   ;;  %v796_v17 = vmul.f32 %v1634_v51, %v773_v13  ;;  %v772_v18 = vmax.f32 %v718_v14, 0.0  ;;  %v733_v19 = vadd.f32 %v1265_v16, %v1628_v38  ;;  %v816_v21 = vadd.f32 %v1641_v55, %v793_v15 }
 0x291   :  { %v727_v22 = vpop.f32.mrf.mxu1 }
 0x292   :  { %v795_v23 = vmul.f32 %v1634_v51, %v772_v18  ;;  %v775_v24 = vmax.f32 %v733_v19, 0.0  ;;  %v728_v25 = vadd.f32 %v1628_v38, %v727_v22  ;;  %v1010_v26 = vpack.c.bf16 %v817_v20, %v816_v21 }
 0x293   :  { %v819_v27 = vadd.f32 %v1641_v55, %v796_v17  ;;  %v1268_v28 = vpop.f32.mrf.mxu1 }
 0x294   :  { %v818_v29 = vadd.f32 %v1641_v55, %v795_v23  ;;  %v798_v30 = vmul.f32 %v1634_v51, %v775_v24  ;;  %v774_v31 = vmax.f32 %v728_v25, 0.0  ;;  %v743_v32 = vadd.f32 %v1268_v28, %v1628_v38  ;;  %1045 = vst [vmem:[%s1722_s10 + $0x10] sm:$0xff] %v1010_v26  }
 0x295   :  { %v737_v33 = vpop.f32.mrf.mxu1 }
 0x296   :  { %v1015_v34 = vpack.c.bf16 %v819_v27, %v818_v29  ;;  %v797_v35 = vmul.f32 %v1634_v51, %v774_v31  ;;  %v777_v36 = vmax.f32 %v743_v32, 0.0  ;;  %v738_v44 = vadd.f32 %v1628_v38, %v737_v33 }
 0x297   :  { %v1271_v37 = vpop.f32.mrf.mxu1  ;;  %v821_v45 = vadd.f32 %v1641_v55, %v798_v30 }
 0x298   :  { %1046 = vst [vmem:[%s1722_s10 + $0x18] sm:$0xff] %v1015_v34   ;;  %v820_v46 = vadd.f32 %v1641_v55, %v797_v35  ;;  %v753_v48 = vadd.f32 %v1271_v37, %v1628_v38  ;;  %v800_v49 = vmul.f32 %v1634_v51, %v777_v36  ;;  %v776_v50 = vmax.f32 %v738_v44, 0.0 }
 0x299   :  { %v747_v52 = vpop.f32.mrf.mxu1 }
 0x29a   :  { %v1020_v53 = vpack.c.bf16 %v821_v45, %v820_v46  ;;  %v779_v39 = vmax.f32 %v753_v48, 0.0  ;;  %v748_v40 = vadd.f32 %v1628_v38, %v747_v52  ;;  %v799_v54 = vmul.f32 %v1634_v51, %v776_v50 }
 0x29b   :  { %v1274_v56 = vpop.f32.mrf.mxu1  ;;  %v823_v47 = vadd.f32 %v1641_v55, %v800_v49 }
 0x29c   :  { %1047 = vst [vmem:[%s1722_s10 + $0x20] sm:$0xff] %v1020_v53   ;;  %v802_v41 = vmul.f32 %v1634_v51, %v779_v39  ;;  %v778_v57 = vmax.f32 %v748_v40, 0.0  ;;  %v763_v42 = vadd.f32 %v1274_v56, %v1628_v38  ;;  %v822_v43 = vadd.f32 %v1641_v55, %v799_v54 }
 0x29d   :  { %v757_v58 = vpop.f32.mrf.mxu1 }
 0x29e   :  { %v801_v59 = vmul.f32 %v1634_v51, %v778_v57  ;;  %v781_v60 = vmax.f32 %v763_v42, 0.0  ;;  %v758_v61 = vadd.f32 %v1628_v38, %v757_v58  ;;  %v1025_v62 = vpack.c.bf16 %v823_v47, %v822_v43 }
 0x29f   :  { %v825_v63 = vadd.f32 %v1641_v55, %v802_v41 }
 0x2a0   :  { %v824_v0 = vadd.f32 %v1641_v55, %v801_v59  ;;  %v804_v1 = vmul.f32 %v1634_v51, %v781_v60  ;;  %v780_v2 = vmax.f32 %v758_v61, 0.0  ;;  %1048 = vst [vmem:[%s1722_s10 + $0x28] sm:$0xff] %v1025_v62  }
 0x2a2   :  { %v1030_v3 = vpack.c.bf16 %v825_v63, %v824_v0  ;;  %v803_v4 = vmul.f32 %v1634_v51, %v780_v2  ;;  %v827_v38 = vadd.f32 %v1641_v55, %v804_v1 }
 0x2a4   :  { %1049 = vst [vmem:[%s1722_s10 + $0x30] sm:$0xff] %v1030_v3   ;;  %v826_v5 = vadd.f32 %v1641_v55, %v803_v4 }
 0x2a6   :  { %v1035_v6 = vpack.c.bf16 %v827_v38, %v826_v5 }
 0x2a8   :  { %1050 = vst [vmem:[%s1722_s10 + $0x38] sm:$0xff] %v1035_v6  }
 0x2a9   :  { %912 = vsyncpa [#allocation5], 1 }

// kernel: gin0_forward.5
= control target key start
LH: loop header
LB: loop body
LE: loop exit
PB: predicated region body
PF: predicated region fallthrough
CT: control target
= control target key end

     0   :  { %s1714_s2 = inlined_call_operand.vmem [shape: bf16[128,128], index: 2, kind: input, shape index: {}, may-alias: {2,3}]   ;;  %s1715_s1 = inlined_call_operand.vmem [shape: bf16[128,128], index: 1, kind: input, shape index: {}]   ;;  %s1716_s4 = inlined_call_operand.vmem [shape: f32[128,128], index: 4, kind: input, shape index: {}]   ;;  %s1717_s6 = inlined_call_operand.vmem [shape: f32[128,128], index: 6, kind: input, shape index: {}]   ;;  %s1718_s0 = inlined_call_operand.<no memory space> [shape: f32[1], index: 0, kind: input, shape index: {}]   ;;  %s1719_s3 = inlined_call_operand.vmem [shape: bf16[128,128], index: 3, kind: input, shape index: {}, may-alias: {2,3}]   ;;  %s1720_s5 = inlined_call_operand.vmem [shape: f32[1,128], index: 5, kind: input, shape index: {}]   ;;  %s1721_s7 = inlined_call_operand.vmem [shape: f32[1,128], index: 7, kind: input, shape index: {}]   ;;  %s1722_s8 = inlined_call_operand.vmem [shape: f32[1,128], index: 8, kind: input, shape index: {}]   ;;  %s1723_s9 = inlined_call_operand.vmem [shape: f32[1,128], index: 9, kind: input, shape index: {}]   ;;  %s1724_s10 = inlined_call_operand.vmem [shape: bf16[128,128], index: 10, kind: output, shape index: {}]  }
   0x1   :  { %v1292_v0 = vld [vmem:[%s1714_s2 + $0x38] sm:$0xff]   ;;  %v1293_v1 = vld [vmem:[%s1714_s2 + $0x30] sm:$0xff]   ;;  %v1294_v2 = vld [vmem:[%s1714_s2 + $0x28] sm:$0xff]  }
   0x2   :  { %1116 = vmatprep.subr.bf16.mxu0 %v1292_v0  ;;  %v1295_v3 = vld [vmem:[%s1714_s2 + $0x20] sm:$0xff]   ;;  %v1296_v5 = vld [vmem:[%s1714_s2 + $0x18] sm:$0xff]   ;;  %v1297_v6 = vld [vmem:[%s1714_s2 + $0x10] sm:$0xff]  }
   0x3   :  { %1117 = vmatpush3.bf16.msra.mxu0 %v1292_v0  ;;  %v1300_v4 = vld [vmem:[%s1715_s1] sm:$0xff]   ;;  %v415_v7 = vld [vmem:[%s1716_s4 + $0x78] sm:$0xff]  ;;  %v414_v8 = vld [vmem:[%s1716_s4 + $0x70] sm:$0xff] }
   0x4   :  { %1118 = vmatprep.subr.bf16.mxu0 %v1293_v1  ;;  %1132 = vmatprep.mubr.bf16.mxu0 %v1300_v4  ;;  %v413_v9 = vld [vmem:[%s1716_s4 + $0x68] sm:$0xff]  ;;  %v412_v11 = vld [vmem:[%s1716_s4 + $0x60] sm:$0xff]  ;;  %v411_v12 = vld [vmem:[%s1716_s4 + $0x58] sm:$0xff] }
   0x5   :  { %1148 = vmatprep.subr.mxu1 %v415_v7  ;;  %v1298_v10 = vld [vmem:[%s1714_s2 + $0x8] sm:$0xff]   ;;  %v1299_v13 = vld [vmem:[%s1714_s2] sm:$0xff]   ;;  %v410_v14 = vld [vmem:[%s1716_s4 + $0x50] sm:$0xff] }
   0x6   :  { %1149 = vmatpush3.msra.mxu1 %v415_v7  ;;  %v409_v15 = vld [vmem:[%s1716_s4 + $0x48] sm:$0xff]  ;;  %v408_v16 = vld [vmem:[%s1716_s4 + $0x40] sm:$0xff]  ;;  %v407_v18 = vld [vmem:[%s1716_s4 + $0x38] sm:$0xff] }
   0x7   :  { %1119 = vmatpush3.bf16.msra.mxu0 %v1293_v1  ;;  %1150 = vmatprep.subr.mxu1 %v414_v8  ;;  %v1301_v17 = vld [vmem:[%s1715_s1 + $0x8] sm:$0xff]   ;;  %v1302_v19 = vld [vmem:[%s1715_s1 + $0x10] sm:$0xff]   ;;  %v404_v22 = vld [vmem:[%s1716_s4 + $0x20] sm:$0xff] }
   0x8   :  { %1120 = vmatprep.subr.bf16.mxu0 %v1294_v2  ;;  %1151 = vmatpush3.msra.mxu1 %v414_v8  ;;  %v406_v20 = vld [vmem:[%s1716_s4 + $0x30] sm:$0xff]  ;;  %v405_v21 = vld [vmem:[%s1716_s4 + $0x28] sm:$0xff]  ;;  %v1303_v23 = vld [vmem:[%s1715_s1 + $0x18] sm:$0xff]  }
   0x9   :  { %1152 = vmatprep.subr.mxu1 %v413_v9  ;;  %v1304_v24 = vld [vmem:[%s1715_s1 + $0x20] sm:$0xff]   ;;  %v1305_v25 = vld [vmem:[%s1715_s1 + $0x28] sm:$0xff]   ;;  %v1306_v26 = vld [vmem:[%s1715_s1 + $0x30] sm:$0xff]  }
   0xa   :  { %1153 = vmatpush3.msra.mxu1 %v413_v9  ;;  %v1307_v27 = vld [vmem:[%s1715_s1 + $0x38] sm:$0xff]   ;;  %v402_v29 = vld [vmem:[%s1716_s4 + $0x10] sm:$0xff]  ;;  %v401_v30 = vld [vmem:[%s1716_s4 + $0x8] sm:$0xff] }
   0xb   :  { %1121 = vmatpush3.bf16.msra.mxu0 %v1294_v2  ;;  %1154 = vmatprep.subr.mxu1 %v412_v11  ;;  %v403_v28 = vld [vmem:[%s1716_s4 + $0x18] sm:$0xff]  ;;  %v400_v31 = vld [vmem:[%s1716_s4] sm:$0xff]  ;;  %v1467_v33 = vld [vmem:[%s1717_s6 + $0x70] sm:$0xff]  ;;  %s42_s4 = sadd.f32 1.0, %s1718_s0 }
   0xc   :  { %1122 = vmatprep.subr.bf16.mxu0 %v1295_v3  ;;  %1155 = vmatpush3.msra.mxu1 %v412_v11  ;;  %v1462_v32 = vld [vmem:[%s1717_s6 + $0x78] sm:$0xff]  ;;  %v1475_v34 = vld [vmem:[%s1717_s6 + $0x68] sm:$0xff]  ;;  %v1482_v35 = vld [vmem:[%s1717_s6 + $0x60] sm:$0xff] }
   0xd   :  { %1156 = vmatprep.subr.mxu1 %v411_v12  ;;  %v1489_v36 = vld [vmem:[%s1717_s6 + $0x58] sm:$0xff]  ;;  %v1496_v37 = vld [vmem:[%s1717_s6 + $0x50] sm:$0xff]  ;;  %v1503_v38 = vld [vmem:[%s1717_s6 + $0x48] sm:$0xff]  ;;  %v1553_v47 = vstv %s42_s4 }
   0xe   :  { %1157 = vmatpush3.msra.mxu1 %v411_v12  ;;  %v1510_v39 = vld [vmem:[%s1717_s6 + $0x40] sm:$0xff]  ;;  %v1517_v40 = vld [vmem:[%s1717_s6 + $0x38] sm:$0xff]  ;;  %v1524_v41 = vld [vmem:[%s1717_s6 + $0x30] sm:$0xff] }
   0xf   :  { %1123 = vmatpush3.bf16.msra.mxu0 %v1295_v3  ;;  %1158 = vmatprep.subr.mxu1 %v410_v14  ;;  %v1531_v42 = vld [vmem:[%s1717_s6 + $0x28] sm:$0xff]  ;;  %v1538_v43 = vld [vmem:[%s1717_s6 + $0x20] sm:$0xff]  ;;  %v1023_v52 = vld [vmem:[%s1719_s3 + $0x10] sm:$0xff]  }
  0x10   :  { %1124 = vmatprep.subr.bf16.mxu0 %v1296_v5  ;;  %1159 = vmatpush3.msra.mxu1 %v410_v14  ;;  %v951_v44 = vld [vmem:[%s1719_s3] sm:$0xff]   ;;  %v1022_v46 = vld [vmem:[%s1719_s3 + $0x8] sm:$0xff]   ;;  %v960_v57 = vunpack.c.l.bf16 %v1023_v52  ;;  %v1024_v60 = vld [vmem:[%s1719_s3 + $0x18] sm:$0xff]   ;;  %v961_v1 = vunpack.c.h.bf16 %v1023_v52 }
  0x11   :  { %1160 = vmatprep.subr.mxu1 %v409_v15  ;;  %v952_v45 = vunpack.c.l.bf16 %v951_v44  ;;  %v953_v49 = vunpack.c.h.bf16 %v951_v44  ;;  %v956_v50 = vunpack.c.l.bf16 %v1022_v46  ;;  %v957_v54 = vunpack.c.h.bf16 %v1022_v46  ;;  %v1026_v14 = vld [vmem:[%s1719_s3 + $0x28] sm:$0xff]  }
  0x12   :  { %1161 = vmatpush3.msra.mxu1 %v409_v15  ;;  %v80_v0 = vmul.f32 %v960_v57, %v1553_v47  ;;  %v964_v3 = vunpack.c.l.bf16 %v1024_v60  ;;  %v965_v7 = vunpack.c.h.bf16 %v1024_v60  ;;  %v914_v57 = vld [vmem:[%s1720_s5] ss:$0 sm:$0xff] }
  0x13   :  { %1125 = vmatpush3.bf16.msra.mxu0 %v1296_v5  ;;  %1162 = vmatprep.subr.mxu1 %v408_v16  ;;  %v76_v48 = vmul.f32 %v952_v45, %v1553_v47  ;;  %v77_v56 = vmul.f32 %v953_v49, %v1553_v47  ;;  %v78_v58 = vmul.f32 %v956_v50, %v1553_v47  ;;  %v1025_v5 = vld [vmem:[%s1719_s3 + $0x20] sm:$0xff]  }
  0x14   :  { %1126 = vmatprep.subr.bf16.mxu0 %v1297_v6  ;;  %1163 = vmatpush3.msra.mxu1 %v408_v16  ;;  %v79_v62 = vmul.f32 %v957_v54, %v1553_v47  ;;  %v968_v11 = vunpack.c.l.bf16 %v1025_v5  ;;  %v82_v12 = vmul.f32 %v964_v3, %v1553_v47  ;;  %v83_v16 = vmul.f32 %v965_v7, %v1553_v47 }
  0x15   :  { %1164 = vmatprep.subr.mxu1 %v407_v18 }
  0x16   :  { %1165 = vmatpush3.msra.mxu1 %v407_v18  ;;  %v84_v18 = vmul.f32 %v968_v11, %v1553_v47 }
  0x17   :  { %1127 = vmatpush3.bf16.msra.mxu0 %v1297_v6  ;;  %1166 = vmatprep.subr.mxu1 %v406_v20 }
  0x18   :  { %1128 = vmatprep.subr.bf16.mxu0 %v1298_v10  ;;  %1167 = vmatpush3.msra.mxu1 %v406_v20 }
  0x19   :  { %1168 = vmatprep.subr.mxu1 %v405_v21 }
  0x1a   :  { %1169 = vmatpush3.msra.mxu1 %v405_v21  ;;  %v972_v21 = vunpack.c.l.bf16 %v1026_v14 }
  0x1b   :  { %1129 = vmatpush3.bf16.msra.mxu0 %v1298_v10  ;;  %1170 = vmatprep.subr.mxu1 %v404_v22  ;;  %v81_v10 = vmul.f32 %v961_v1, %v1553_v47 }
  0x1c   :  { %1130 = vmatprep.subr.bf16.mxu0 %v1299_v13  ;;  %1171 = vmatpush3.msra.mxu1 %v404_v22 }
  0x1d   :  { %1172 = vmatprep.subr.mxu1 %v403_v28 }
  0x1e   :  { %1173 = vmatpush3.msra.mxu1 %v403_v28 }
  0x1f   :  { %1131 = vmatpush3.bf16.msra.mxu0 %v1299_v13  ;;  %1174 = vmatprep.subr.mxu1 %v402_v29 }
  0x20   :  { %1175 = vmatpush3.msra.mxu1 %v402_v29  ;;  %1204 = vmatprep.subr.mxu0 %v1462_v32 }
  0x21   :  { %1176 = vmatprep.subr.mxu1 %v401_v30 }
  0x22   :  { %1133 = vmatmul.mubr.bf16.vlgmr.msra.gmra.mxu0 %v1301_v17  ;;  %1177 = vmatpush3.msra.mxu1 %v401_v30  ;;  %v86_v30 = vmul.f32 %v972_v21, %v1553_v47 }
  0x23   :  { %1136 = vmatprep.mubr.bf16.mxu0 %v1302_v19  ;;  %1178 = vmatprep.subr.mxu1 %v400_v31  ;;  %v969_v19 = vunpack.c.h.bf16 %v1025_v5 }
  0x24   :  { %1179 = vmatpush3.msra.mxu1 %v400_v31  ;;  %1205 = vmatpush3.msra.mxu0 %v1462_v32 }
  0x25   :  { %1260 = vmatprep.subr.mxu1 %v1462_v32  ;;  %1206 = vmatprep.subr.mxu0 %v1467_v33  ;;  %v85_v28 = vmul.f32 %v969_v19, %v1553_v47 }
  0x26   :  { %1207 = vmatpush3.msra.mxu0 %v1467_v33 }
  0x27   :  { %1208 = vmatprep.subr.mxu0 %v1475_v34 }
  0x28   :  { %1209 = vmatpush3.msra.mxu0 %v1475_v34 }
  0x29   :  { %1210 = vmatprep.subr.mxu0 %v1482_v35 }
  0x2a   :  { %1137 = vmatmul.mubr.bf16.gmra.mxu0 %v1303_v23  ;;  %v1027_v23 = vld [vmem:[%s1719_s3 + $0x30] sm:$0xff]  }
  0x2b   :  { %1140 = vmatprep.mubr.bf16.mxu0 %v1304_v24  ;;  %1211 = vmatpush3.msra.mxu0 %v1482_v35  ;;  %v976_v29 = vunpack.c.l.bf16 %v1027_v23  ;;  %v977_v44 = vunpack.c.h.bf16 %v1027_v23 }
  0x2c   :  { %1212 = vmatprep.subr.mxu0 %v1489_v36 }
  0x2d   :  { %1213 = vmatpush3.msra.mxu0 %v1489_v36 }
  0x2e   :  { %1214 = vmatprep.subr.mxu0 %v1496_v37 }
  0x2f   :  { %1215 = vmatpush3.msra.mxu0 %v1496_v37 }
  0x30   :  { %1216 = vmatprep.subr.mxu0 %v1503_v38 }
  0x31   :  { %1217 = vmatpush3.msra.mxu0 %v1503_v38 }
  0x32   :  { %1141 = vmatmul.mubr.bf16.gmra.mxu0 %v1305_v25  ;;  %1218 = vmatprep.subr.mxu0 %v1510_v39  ;;  %v973_v25 = vunpack.c.h.bf16 %v1026_v14 }
  0x33   :  { %1144 = vmatprep.mubr.bf16.mxu0 %v1306_v26  ;;  %1219 = vmatpush3.msra.mxu0 %v1510_v39 }
  0x34   :  { %1220 = vmatprep.subr.mxu0 %v1517_v40 }
  0x35   :  { %1221 = vmatpush3.msra.mxu0 %v1517_v40 }
  0x36   :  { %1222 = vmatprep.subr.mxu0 %v1524_v41 }
  0x37   :  { %1223 = vmatpush3.msra.mxu0 %v1524_v41 }
  0x38   :  { %1224 = vmatprep.subr.mxu0 %v1531_v42 }
  0x39   :  { %1225 = vmatpush3.msra.mxu0 %v1531_v42 }
  0x3a   :  { %1145 = vmatmul.mubr.bf16.gmra.mxu0 %v1307_v27  ;;  %1226 = vmatprep.subr.mxu0 %v1538_v43 }
  0x3b   :  { %1227 = vmatpush3.msra.mxu0 %v1538_v43 }
  0xe2   :  { %v1134_v51 = vpop.f32.mrf.mxu0 }
  0xe3   :  { %v351_v2 = vadd.f32 %v1134_v51, %v78_v58  ;;  %v89_v51 = vmul.f32 %v977_v44, %v1553_v47 }
  0xe4   :  { %v286_v53 = vpop.f32.mrf.mxu0 }
  0xe5   :  { %v349_v55 = vadd.f32 %v286_v53, %v76_v48 }
  0xe6   :  { %v1135_v59 = vpop.f32.mrf.mxu0 }
  0xe7   :  { %1180 = vmatprep.mubr.f32.mxu1 %v349_v55  ;;  %v352_v8 = vadd.f32 %v1135_v59, %v79_v62 }
  0xe8   :  { %v289_v61 = vpop.f32.mrf.mxu0 }
  0xe9   :  { %v350_v63 = vadd.f32 %v289_v61, %v77_v56 }
  0xea   :  { %v1138_v4 = vpop.f32.mrf.mxu0 }
  0xeb   :  { %1181 = vmatmul.mubr.f32.vlgmr.msra.gmra.mxu1 %v350_v63  ;;  %v355_v20 = vadd.f32 %v1138_v4, %v82_v12 }
  0xec   :  { %v302_v6 = vpop.f32.mrf.mxu0  ;;  %1183 = vmatprep.mubr.f32.mxu1 %v351_v2  ;;  %1276 = vmatpush3.msra.mxu1 %v1462_v32  ;;  %v1028_v32 = vld [vmem:[%s1719_s3 + $0x38] sm:$0xff]  }
  0xed   :  { %v353_v9 = vadd.f32 %v302_v6, %v80_v0  ;;  %1261 = vmatprep.subr.mxu1 %v1467_v33  ;;  %v980_v45 = vunpack.c.l.bf16 %v1028_v32  ;;  %v981_v50 = vunpack.c.h.bf16 %v1028_v32 }
  0xee   :  { %v1139_v13 = vpop.f32.mrf.mxu0  ;;  %1277 = vmatpush3.msra.mxu1 %v1467_v33 }
  0xef   :  { %1184 = vmatmul.mubr.f32.gmra.mxu1 %v352_v8  ;;  %1262 = vmatprep.subr.mxu1 %v1475_v34  ;;  %v356_v26 = vadd.f32 %v1139_v13, %v83_v16  ;;  %v90_v52 = vmul.f32 %v980_v45, %v1553_v47 }
  0xf0   :  { %v305_v15 = vpop.f32.mrf.mxu0  ;;  %1186 = vmatprep.mubr.f32.mxu1 %v353_v9  ;;  %1278 = vmatpush3.msra.mxu1 %v1475_v34  ;;  %v87_v34 = vmul.f32 %v973_v25, %v1553_v47 }
  0xf1   :  { %v354_v17 = vadd.f32 %v305_v15, %v81_v10  ;;  %1263 = vmatprep.subr.mxu1 %v1482_v35 }
  0xf2   :  { %v1142_v22 = vpop.f32.mrf.mxu0  ;;  %1279 = vmatpush3.msra.mxu1 %v1482_v35 }
  0xf3   :  { %1187 = vmatmul.mubr.f32.gmra.mxu1 %v354_v17  ;;  %1264 = vmatprep.subr.mxu1 %v1489_v36 }
  0xf4   :  { %v318_v24 = vpop.f32.mrf.mxu0  ;;  %1189 = vmatprep.mubr.f32.mxu1 %v355_v20  ;;  %1280 = vmatpush3.msra.mxu1 %v1489_v36  ;;  %v88_v36 = vmul.f32 %v976_v29, %v1553_v47 }
  0xf5   :  { %v357_v27 = vadd.f32 %v318_v24, %v84_v18  ;;  %1265 = vmatprep.subr.mxu1 %v1496_v37 }
  0xf6   :  { %v1143_v31 = vpop.f32.mrf.mxu0  ;;  %1281 = vmatpush3.msra.mxu1 %v1496_v37  ;;  %v359_v37 = vadd.f32 %v1142_v22, %v86_v30 }
  0xf7   :  { %1190 = vmatmul.mubr.f32.gmra.mxu1 %v356_v26  ;;  %1266 = vmatprep.subr.mxu1 %v1503_v38 }
  0xf8   :  { %v321_v33 = vpop.f32.mrf.mxu0  ;;  %1192 = vmatprep.mubr.f32.mxu1 %v357_v27  ;;  %1282 = vmatpush3.msra.mxu1 %v1503_v38  ;;  %v360_v38 = vadd.f32 %v1143_v31, %v87_v34 }
  0xf9   :  { %v358_v35 = vadd.f32 %v321_v33, %v85_v28  ;;  %1267 = vmatprep.subr.mxu1 %v1510_v39 }
  0xfa   :  { %v1146_v46 = vpop.f32.mrf.mxu0  ;;  %1283 = vmatpush3.msra.mxu1 %v1510_v39 }
  0xfb   :  { %1193 = vmatmul.mubr.f32.gmra.mxu1 %v358_v35  ;;  %1268 = vmatprep.subr.mxu1 %v1517_v40  ;;  %v363_v55 = vadd.f32 %v1146_v46, %v90_v52 }
  0xfc   :  { %v334_v48 = vpop.f32.mrf.mxu0  ;;  %1195 = vmatprep.mubr.f32.mxu1 %v359_v37  ;;  %1284 = vmatpush3.msra.mxu1 %v1517_v40  ;;  %v91_v40 = vmul.f32 %v981_v50, %v1553_v47  ;;  %v584_v47 = vld [vmem:[%s1717_s6] sm:$0xff] }
  0xfd   :  { %v361_v49 = vadd.f32 %v334_v48, %v88_v36  ;;  %1269 = vmatprep.subr.mxu1 %v1524_v41 }
  0xfe   :  { %v1147_v53 = vpop.f32.mrf.mxu0  ;;  %1285 = vmatpush3.msra.mxu1 %v1524_v41  ;;  %v587_v41 = vld [vmem:[%s1717_s6 + $0x18] sm:$0xff] }
  0xff   :  { %1196 = vmatmul.mubr.f32.gmra.mxu1 %v360_v38  ;;  %1270 = vmatprep.subr.mxu1 %v1531_v42  ;;  %v364_v56 = vadd.f32 %v1147_v53, %v91_v40  ;;  %v1630_v38 = vld [vmem:[%s1721_s7] ss:$0 sm:$0xff] }
 0x100   :  { %v337_v39 = vpop.f32.mrf.mxu0  ;;  %1198 = vmatprep.mubr.f32.mxu1 %v361_v49  ;;  %1286 = vmatpush3.msra.mxu1 %v1531_v42  ;;  %v586_v42 = vld [vmem:[%s1717_s6 + $0x10] sm:$0xff] }
 0x101   :  { %v362_v54 = vadd.f32 %v337_v39, %v89_v51  ;;  %1271 = vmatprep.subr.mxu1 %v1538_v43  ;;  %1228 = vmatprep.subr.mxu0 %v587_v41  ;;  %v1636_v51 = vld [vmem:[%s1722_s8] ss:$0 sm:$0xff] }
 0x102   :  { %1287 = vmatpush3.msra.mxu1 %v1538_v43  ;;  %1229 = vmatpush3.msra.mxu0 %v587_v41  ;;  %v585_v43 = vld [vmem:[%s1717_s6 + $0x8] sm:$0xff] }
 0x103   :  { %1199 = vmatmul.mubr.f32.gmra.mxu1 %v362_v54  ;;  %1272 = vmatprep.subr.mxu1 %v587_v41 }
 0x104   :  { %1201 = vmatprep.mubr.f32.mxu1 %v363_v55  ;;  %1288 = vmatpush3.msra.mxu1 %v587_v41  ;;  %v1643_v55 = vld [vmem:[%s1723_s9] ss:$0 sm:$0xff] }
 0x105   :  { %1230 = vmatprep.subr.mxu0 %v586_v42  ;;  %1273 = vmatprep.subr.mxu1 %v586_v42 }
 0x106   :  { %1231 = vmatpush3.msra.mxu0 %v586_v42  ;;  %1289 = vmatpush3.msra.mxu1 %v586_v42 }
 0x107   :  { %1202 = vmatmul.mubr.f32.gmra.mxu1 %v364_v56  ;;  %1232 = vmatprep.subr.mxu0 %v585_v43 }
 0x108   :  { %1274 = vmatprep.subr.mxu1 %v585_v43  ;;  %1233 = vmatpush3.msra.mxu0 %v585_v43 }
 0x109   :  { %1290 = vmatpush3.msra.mxu1 %v585_v43  ;;  %1234 = vmatprep.subr.mxu0 %v584_v47 }
 0x10a   :  { %1275 = vmatprep.subr.mxu1 %v584_v47  ;;  %1235 = vmatpush3.msra.mxu0 %v584_v47 }
 0x10b   :  { %1291 = vmatpush3.msra.mxu1 %v584_v47 }
 0x1ab   :  { %v1182_v58 = vpop.f32.mrf.mxu1 }
 0x1ac   :  { %v495_v59 = vadd.f32 %v1182_v58, %v914_v57 }
 0x1ad   :  { %v489_v60 = vpop.f32.mrf.mxu1 }
 0x1ae   :  { %v490_v61 = vadd.f32 %v914_v57, %v489_v60  ;;  %v569_v0 = vmax.f32 %v495_v59, 0.0 }
 0x1af   :  { %v1185_v62 = vpop.f32.mrf.mxu1 }
 0x1b0   :  { %v568_v63 = vmax.f32 %v490_v61, 0.0  ;;  %v505_v1 = vadd.f32 %v1185_v62, %v914_v57 }
 0x1b1   :  { %v499_v2 = vpop.f32.mrf.mxu1 }
 0x1b2   :  { %v500_v3 = vadd.f32 %v914_v57, %v499_v2  ;;  %1236 = vmatprep.mubr.f32.mxu0 %v568_v63  ;;  %v571_v6 = vmax.f32 %v505_v1, 0.0 }
 0x1b3   :  { %v1188_v4 = vpop.f32.mrf.mxu1  ;;  %1237 = vmatmul.mubr.f32.vlgmr.msra.gmra.mxu0 %v569_v0 }
 0x1b4   :  { %v570_v5 = vmax.f32 %v500_v3, 0.0  ;;  %v515_v7 = vadd.f32 %v1188_v4, %v914_v57 }
 0x1b5   :  { %v509_v8 = vpop.f32.mrf.mxu1 }
 0x1b6   :  { %v510_v9 = vadd.f32 %v914_v57, %v509_v8  ;;  %1239 = vmatprep.mubr.f32.mxu0 %v570_v5  ;;  %v573_v12 = vmax.f32 %v515_v7, 0.0 }
 0x1b7   :  { %v1191_v10 = vpop.f32.mrf.mxu1  ;;  %1240 = vmatmul.mubr.f32.gmra.mxu0 %v571_v6 }
 0x1b8   :  { %v572_v11 = vmax.f32 %v510_v9, 0.0  ;;  %v525_v13 = vadd.f32 %v1191_v10, %v914_v57 }
 0x1b9   :  { %v519_v14 = vpop.f32.mrf.mxu1 }
 0x1ba   :  { %v520_v15 = vadd.f32 %v914_v57, %v519_v14  ;;  %1242 = vmatprep.mubr.f32.mxu0 %v572_v11  ;;  %v575_v18 = vmax.f32 %v525_v13, 0.0 }
 0x1bb   :  { %v1194_v16 = vpop.f32.mrf.mxu1  ;;  %1243 = vmatmul.mubr.f32.gmra.mxu0 %v573_v12 }
 0x1bc   :  { %v574_v17 = vmax.f32 %v520_v15, 0.0  ;;  %v535_v19 = vadd.f32 %v1194_v16, %v914_v57 }
 0x1bd   :  { %v529_v20 = vpop.f32.mrf.mxu1 }
 0x1be   :  { %v530_v21 = vadd.f32 %v914_v57, %v529_v20  ;;  %1245 = vmatprep.mubr.f32.mxu0 %v574_v17  ;;  %v577_v24 = vmax.f32 %v535_v19, 0.0 }
 0x1bf   :  { %v1197_v22 = vpop.f32.mrf.mxu1  ;;  %1246 = vmatmul.mubr.f32.gmra.mxu0 %v575_v18 }
 0x1c0   :  { %v576_v23 = vmax.f32 %v530_v21, 0.0  ;;  %v545_v25 = vadd.f32 %v1197_v22, %v914_v57 }
 0x1c1   :  { %v539_v26 = vpop.f32.mrf.mxu1 }
 0x1c2   :  { %v540_v27 = vadd.f32 %v914_v57, %v539_v26  ;;  %1248 = vmatprep.mubr.f32.mxu1 %v576_v23  ;;  %v579_v30 = vmax.f32 %v545_v25, 0.0 }
 0x1c3   :  { %v1200_v28 = vpop.f32.mrf.mxu1  ;;  %1249 = vmatmul.mubr.f32.vlgmr.msra.gmra.mxu1 %v577_v24 }
 0x1c4   :  { %v578_v29 = vmax.f32 %v540_v27, 0.0  ;;  %v555_v31 = vadd.f32 %v1200_v28, %v914_v57 }
 0x1c5   :  { %v549_v32 = vpop.f32.mrf.mxu1 }
 0x1c6   :  { %v550_v33 = vadd.f32 %v914_v57, %v549_v32  ;;  %1251 = vmatprep.mubr.f32.mxu1 %v578_v29  ;;  %v581_v36 = vmax.f32 %v555_v31, 0.0 }
 0x1c7   :  { %v1203_v34 = vpop.f32.mrf.mxu1  ;;  %1252 = vmatmul.mubr.f32.gmra.mxu1 %v579_v30 }
 0x1c8   :  { %v580_v35 = vmax.f32 %v550_v33, 0.0  ;;  %v565_v44 = vadd.f32 %v1203_v34, %v914_v57 }
 0x1c9   :  { %v559_v37 = vpop.f32.mrf.mxu1 }
 0x1ca   :  { %v560_v45 = vadd.f32 %v914_v57, %v559_v37  ;;  %1254 = vmatprep.mubr.f32.mxu1 %v580_v35  ;;  %v583_v48 = vmax.f32 %v565_v44, 0.0 }
 0x1cb   :  { %1255 = vmatmul.mubr.f32.gmra.mxu1 %v581_v36 }
 0x1cc   :  { %v582_v46 = vmax.f32 %v560_v45, 0.0 }
 0x1ce   :  { %1257 = vmatprep.mubr.f32.mxu1 %v582_v46 }
 0x1cf   :  { %1258 = vmatmul.mubr.f32.gmra.mxu1 %v583_v48 }
 0x273   :  { %v1238_v49 = vpop.f32.mrf.mxu0 }
 0x274   :  { %v679_v50 = vadd.f32 %v1238_v49, %v1630_v38 }
 0x275   :  { %v673_v52 = vpop.f32.mrf.mxu0 }
 0x276   :  { %v753_v53 = vmax.f32 %v679_v50, 0.0  ;;  %v674_v39 = vadd.f32 %v1630_v38, %v673_v52 }
 0x277   :  { %v1241_v40 = vpop.f32.mrf.mxu0 }
 0x278   :  { %v776_v54 = vmul.f32 %v1636_v51, %v753_v53  ;;  %v752_v56 = vmax.f32 %v674_v39, 0.0  ;;  %v689_v41 = vadd.f32 %v1241_v40, %v1630_v38 }
 0x279   :  { %v683_v42 = vpop.f32.mrf.mxu0 }
 0x27a   :  { %v775_v43 = vmul.f32 %v1636_v51, %v752_v56  ;;  %v755_v47 = vmax.f32 %v689_v41, 0.0  ;;  %v684_v57 = vadd.f32 %v1630_v38, %v683_v42  ;;  %v799_v58 = vadd.f32 %v1643_v55, %v776_v54 }
 0x27b   :  { %v1244_v59 = vpop.f32.mrf.mxu0 }
 0x27c   :  { %v798_v60 = vadd.f32 %v1643_v55, %v775_v43  ;;  %v778_v61 = vmul.f32 %v1636_v51, %v755_v47  ;;  %v754_v62 = vmax.f32 %v684_v57, 0.0  ;;  %v699_v63 = vadd.f32 %v1244_v59, %v1630_v38 }
 0x27d   :  { %v693_v0 = vpop.f32.mrf.mxu0 }
 0x27e   :  { %v985_v1 = vpack.c.bf16 %v799_v58, %v798_v60  ;;  %v777_v2 = vmul.f32 %v1636_v51, %v754_v62  ;;  %v757_v3 = vmax.f32 %v699_v63, 0.0  ;;  %v694_v4 = vadd.f32 %v1630_v38, %v693_v0 }
 0x27f   :  { %v1247_v5 = vpop.f32.mrf.mxu0  ;;  %v801_v6 = vadd.f32 %v1643_v55, %v778_v61 }
 0x280   :  { %986 = vst [vmem:[%s1724_s10] sm:$0xff] %v985_v1   ;;  %v800_v7 = vadd.f32 %v1643_v55, %v777_v2  ;;  %v709_v8 = vadd.f32 %v1247_v5, %v1630_v38  ;;  %v780_v9 = vmul.f32 %v1636_v51, %v757_v3  ;;  %v756_v10 = vmax.f32 %v694_v4, 0.0 }
 0x281   :  { %v703_v11 = vpop.f32.mrf.mxu0 }
 0x282   :  { %v990_v12 = vpack.c.bf16 %v801_v6, %v800_v7  ;;  %v759_v13 = vmax.f32 %v709_v8, 0.0  ;;  %v704_v14 = vadd.f32 %v1630_v38, %v703_v11  ;;  %v779_v15 = vmul.f32 %v1636_v51, %v756_v10 }
 0x283   :  { %v1250_v16 = vpop.f32.mrf.mxu1  ;;  %v803_v20 = vadd.f32 %v1643_v55, %v780_v9 }
 0x284   :  { %1029 = vst [vmem:[%s1724_s10 + $0x8] sm:$0xff] %v990_v12   ;;  %v782_v17 = vmul.f32 %v1636_v51, %v759_v13  ;;  %v758_v18 = vmax.f32 %v704_v14, 0.0  ;;  %v719_v19 = vadd.f32 %v1250_v16, %v1630_v38  ;;  %v802_v21 = vadd.f32 %v1643_v55, %v779_v15 }
 0x285   :  { %v713_v22 = vpop.f32.mrf.mxu1 }
 0x286   :  { %v781_v23 = vmul.f32 %v1636_v51, %v758_v18  ;;  %v761_v24 = vmax.f32 %v719_v19, 0.0  ;;  %v714_v25 = vadd.f32 %v1630_v38, %v713_v22  ;;  %v995_v26 = vpack.c.bf16 %v803_v20, %v802_v21 }
 0x287   :  { %v805_v27 = vadd.f32 %v1643_v55, %v782_v17  ;;  %v1253_v28 = vpop.f32.mrf.mxu1 }
 0x288   :  { %v804_v29 = vadd.f32 %v1643_v55, %v781_v23  ;;  %v784_v30 = vmul.f32 %v1636_v51, %v761_v24  ;;  %v760_v31 = vmax.f32 %v714_v25, 0.0  ;;  %v729_v32 = vadd.f32 %v1253_v28, %v1630_v38  ;;  %1030 = vst [vmem:[%s1724_s10 + $0x10] sm:$0xff] %v995_v26  }
 0x289   :  { %v723_v33 = vpop.f32.mrf.mxu1 }
 0x28a   :  { %v1000_v34 = vpack.c.bf16 %v805_v27, %v804_v29  ;;  %v783_v35 = vmul.f32 %v1636_v51, %v760_v31  ;;  %v763_v36 = vmax.f32 %v729_v32, 0.0  ;;  %v724_v44 = vadd.f32 %v1630_v38, %v723_v33 }
 0x28b   :  { %v1256_v37 = vpop.f32.mrf.mxu1  ;;  %v807_v45 = vadd.f32 %v1643_v55, %v784_v30 }
 0x28c   :  { %1031 = vst [vmem:[%s1724_s10 + $0x18] sm:$0xff] %v1000_v34   ;;  %v806_v46 = vadd.f32 %v1643_v55, %v783_v35  ;;  %v739_v48 = vadd.f32 %v1256_v37, %v1630_v38  ;;  %v786_v49 = vmul.f32 %v1636_v51, %v763_v36  ;;  %v762_v50 = vmax.f32 %v724_v44, 0.0 }
 0x28d   :  { %v733_v52 = vpop.f32.mrf.mxu1 }
 0x28e   :  { %v1005_v53 = vpack.c.bf16 %v807_v45, %v806_v46  ;;  %v765_v39 = vmax.f32 %v739_v48, 0.0  ;;  %v734_v40 = vadd.f32 %v1630_v38, %v733_v52  ;;  %v785_v54 = vmul.f32 %v1636_v51, %v762_v50 }
 0x28f   :  { %v1259_v56 = vpop.f32.mrf.mxu1  ;;  %v809_v47 = vadd.f32 %v1643_v55, %v786_v49 }
 0x290   :  { %1032 = vst [vmem:[%s1724_s10 + $0x20] sm:$0xff] %v1005_v53   ;;  %v788_v41 = vmul.f32 %v1636_v51, %v765_v39  ;;  %v764_v42 = vmax.f32 %v734_v40, 0.0  ;;  %v749_v43 = vadd.f32 %v1259_v56, %v1630_v38  ;;  %v808_v57 = vadd.f32 %v1643_v55, %v785_v54 }
 0x291   :  { %v743_v58 = vpop.f32.mrf.mxu1 }
 0x292   :  { %v787_v59 = vmul.f32 %v1636_v51, %v764_v42  ;;  %v767_v60 = vmax.f32 %v749_v43, 0.0  ;;  %v744_v61 = vadd.f32 %v1630_v38, %v743_v58  ;;  %v1010_v62 = vpack.c.bf16 %v809_v47, %v808_v57 }
 0x293   :  { %v811_v63 = vadd.f32 %v1643_v55, %v788_v41 }
 0x294   :  { %v810_v0 = vadd.f32 %v1643_v55, %v787_v59  ;;  %v790_v1 = vmul.f32 %v1636_v51, %v767_v60  ;;  %v766_v2 = vmax.f32 %v744_v61, 0.0  ;;  %1033 = vst [vmem:[%s1724_s10 + $0x28] sm:$0xff] %v1010_v62  }
 0x296   :  { %v1015_v3 = vpack.c.bf16 %v811_v63, %v810_v0  ;;  %v789_v4 = vmul.f32 %v1636_v51, %v766_v2  ;;  %v813_v38 = vadd.f32 %v1643_v55, %v790_v1 }
 0x298   :  { %1034 = vst [vmem:[%s1724_s10 + $0x30] sm:$0xff] %v1015_v3   ;;  %v812_v5 = vadd.f32 %v1643_v55, %v789_v4 }
 0x29a   :  { %v1020_v6 = vpack.c.bf16 %v813_v38, %v812_v5 }
 0x29c   :  { %1035 = vst [vmem:[%s1724_s10 + $0x38] sm:$0xff] %v1020_v6  }

</bundles_post_ra>
